<compile_context>
chip_gen: v7x
topology: tpu7x:2x2x1
jax: 0.10.0
libtpu: 0.0.40
codegen_flags: <defaults>
</compile_context>

<pallas_src>
import functools

import jax
import jax.numpy as jnp
from jax import lax
from jax.experimental import pallas as pl
from jax.experimental.pallas import tpu as pltpu


def _bottleneck_kernel(x_ref, w1_ref, w2_ref, w3_ref,
                       s1_ref, b1_ref, s2_ref, b2_ref, s3_ref, b3_ref,
                       o_ref, *, TH, H, W, P):
    """One (batch, row-band) grid step.

    x_ref : (1, H+2, W+2, Cin) zero-padded input image, resident per batch n.
    o_ref : (1, TH, W, Cin) output row band.
    """
    b = pl.program_id(1)
    Cin = x_ref.shape[3]
    row0 = pl.multiple_of(b * TH, TH)          # first padded row of this band

    # Band + 1-row halo of the padded input: (TH+2, W+2, Cin), f32.
    xh = x_ref[0, pl.ds(row0, TH + 2), :, :]

    # ---- conv1 (1x1, no bias) + bn1 + relu on band + halo -------------------
    xh2 = xh.reshape((TH + 2) * (W + 2), Cin)
    a1 = jnp.dot(xh2.astype(jnp.bfloat16), w1_ref[...],
                 preferred_element_type=jnp.float32)
    a1 = jnp.maximum(a1 * s1_ref[0] + b1_ref[0], 0.0)
    a1 = a1.reshape(TH + 2, W + 2, P)

    # conv2's zero padding applies to its *input* (post-BN/ReLU activations),
    # so positions of a1 that land on the padded border must be exactly zero
    # (relu(conv1(0)*s1 + b1) is not zero in general).  Mask them.
    shp = (TH + 2, W + 2, P)
    ri = lax.broadcasted_iota(jnp.int32, shp, 0) + row0   # padded row index
    ci = lax.broadcasted_iota(jnp.int32, shp, 1)          # padded col index
    valid = (ri >= 1) & (ri <= H) & (ci >= 1) & (ci <= W)
    a1 = jnp.where(valid, a1, 0.0).astype(jnp.bfloat16)

    # ---- conv2 (3x3, stride 1, pad 1): one deep matmul, K = 9*P -------------
    taps = [a1[dy:dy + TH, dx:dx + W, :]
            for dy in range(3) for dx in range(3)]
    patch = jnp.concatenate(taps, axis=-1).reshape(TH * W, 9 * P)
    out2 = jnp.dot(patch, w2_ref[...], preferred_element_type=jnp.float32)
    out2 = jnp.maximum(out2 * s2_ref[0] + b2_ref[0], 0.0)

    # ---- conv3 (1x1, no bias) + bn3 + residual + relu -----------------------
    out3 = jnp.dot(out2.astype(jnp.bfloat16), w3_ref[...],
                   preferred_element_type=jnp.float32)
    out3 = out3 * s3_ref[0] + b3_ref[0]
    res = xh[1:TH + 1, 1:W + 1, :].reshape(TH * W, Cin)   # residual in f32
    o_ref[0] = jnp.maximum(out3 + res, 0.0).reshape(TH, W, Cin)


def bottleneck_forward_nhwc(x_nhwc, params, *, band_rows=8):
    """x_nhwc: (N, H, W, Cin) float32.  Returns (N, H, W, Cin) float32 NHWC."""
    w1, w2f, w3, s1, b1, s2, b2, s3, b3 = params
    N, H, W, Cin = x_nhwc.shape
    P = w1.shape[1]
    assert w1.shape[0] == Cin
    assert w3.shape[1] == Cin, "downsample=None requires inplanes == planes*4"

    TH = band_rows if (H % band_rows == 0) else H
    HB = H // TH

    # Zero-pad spatially once in HBM (replaces the per-step padded VMEM scratch).
    x_pad = jnp.pad(x_nhwc, ((0, 0), (1, 1), (1, 1), (0, 0)))

    def full_spec(shape):
        nd = len(shape)
        return pl.BlockSpec(shape, lambda n, b, _nd=nd: (0,) * _nd)

    kernel = functools.partial(_bottleneck_kernel, TH=TH, H=H, W=W, P=P)

    return pl.pallas_call(
        kernel,
        out_shape=jax.ShapeDtypeStruct((N, H, W, Cin), jnp.float32),
        grid=(N, HB),
        in_specs=[
            # Padded image: block index ignores the band axis -> stays resident
            # in VMEM across all bands of one batch element (loaded once per n).
            pl.BlockSpec((1, H + 2, W + 2, Cin), lambda n, b: (n, 0, 0, 0)),
            full_spec(w1.shape), full_spec(w2f.shape), full_spec(w3.shape),
            full_spec(s1.shape), full_spec(b1.shape),
            full_spec(s2.shape), full_spec(b2.shape),
            full_spec(s3.shape), full_spec(b3.shape),
        ],
        out_specs=pl.BlockSpec((1, TH, W, Cin), lambda n, b: (n, b, 0, 0)),
        compiler_params=pltpu.CompilerParams(
            dimension_semantics=("parallel", "parallel"),
            vmem_limit_bytes=32 * 1024 * 1024),
    )(x_pad, w1, w2f, w3, s1, b1, s2, b2, s3, b3)


def bottleneck_forward(x_nchw, params, **kw):
    """PyTorch-layout convenience wrapper (NCHW in / NCHW out)."""
    x = jnp.transpose(x_nchw, (0, 2, 3, 1))       # -> NHWC
    out = bottleneck_forward_nhwc(x, params, **kw)
    return jnp.transpose(out, (0, 3, 1, 2))       # -> NCHW


if __name__ == "__main__":
    # Small shapes consistent with the module (inplanes = planes * expansion),
    # chosen so the output channel (lane) dimension is dense (Cin = 128).
    N, planes, H, W = 2, 32, 16, 16
    Cin = planes * 4                              # 128

    key = jax.random.PRNGKey(0)
    k = jax.random.split(key, 8)
    x_nchw = jax.random.normal(k[0], (N, Cin, H, W), jnp.float32)

    # PyTorch conv weight layout: OIHW.
    conv1_w = jax.random.normal(k[1], (planes, Cin, 1, 1), jnp.float32) * 0.1
    conv2_w = jax.random.normal(k[2], (planes, planes, 3, 3), jnp.float32) * 0.1
    conv3_w = jax.random.normal(k[3], (Cin, planes, 1, 1), jnp.float32) * 0.1

    eps = 1e-5

    def bn_params(kk, c):
        kg, kb = jax.random.split(kk)
        gamma = 1.0 + 0.1 * jax.random.normal(kg, (c,), jnp.float32)
        beta = 0.1 * jax.random.normal(kb, (c,), jnp.float32)
        mean = jnp.zeros((c,), jnp.float32)
        var = jnp.ones((c,), jnp.float32)
        scale = gamma / jnp.sqrt(var + eps)
        bias = beta - mean * scale
        return scale, bias

    s1, b1 = bn_params(k[4], planes)
    s2, b2 = bn_params(k[5], planes)
    s3, b3 = bn_params(k[6], Cin)

    # Kernel-layout weights (bf16 matmul inputs):
    #   1x1 convs -> (Cin_in, Cout) matmuls; 3x3 -> flattened (9*P, P) im2col weight.
    w1 = conv1_w[:, :, 0, 0].T.astype(jnp.bfloat16)                       # (Cin, P)
    w2f = jnp.transpose(conv2_w, (2, 3, 1, 0)).reshape(
        9 * planes, planes).astype(jnp.bfloat16)                          # (9P, P)
    w3 = conv3_w[:, :, 0, 0].T.astype(jnp.bfloat16)                       # (P, Cin)

    params = (w1, w2f, w3,
              s1.reshape(1, -1), b1.reshape(1, -1),
              s2.reshape(1, -1), b2.reshape(1, -1),
              s3.reshape(1, -1), b3.reshape(1, -1))

    out = jax.block_until_ready(bottleneck_forward(x_nchw, params))

    # Pure-JAX f32 reference (same folded eval-mode BN) for a sanity check.
    def conv(x, w, pad):
        return jax.lax.conv_general_dilated(
            x, w, (1, 1), pad, dimension_numbers=("NCHW", "OIHW", "NCHW"))

    def bn(y, s, b):
        return y * s[None, :, None, None] + b[None, :, None, None]

    r = jax.nn.relu(bn(conv(x_nchw, conv1_w, "VALID"), s1, b1))
    r = jax.nn.relu(bn(conv(r, conv2_w, [(1, 1), (1, 1)]), s2, b2))
    r = bn(conv(r, conv3_w, "VALID"), s3, b3) + x_nchw
    ref = jax.nn.relu(r)

    assert out.shape == x_nchw.shape
    err = float(jnp.max(jnp.abs(out - ref)))
    assert err < 1e-1, f"max abs err {err}"   # bf16 matmul inputs, f32 accumulation
    print("KERNEL_OK")
</pallas_src>

<mosaic_0001>
module attributes {stable_mosaic.version = 11 : i64} {
  func.func @_bottleneck_kernel(%arg0: i32, %arg1: i32, %arg2: memref<1x18x18x128xf32, #tpu.memory_space<vmem>>, %arg3: memref<128x32xbf16, #tpu.memory_space<vmem>>, %arg4: memref<288x32xbf16, #tpu.memory_space<vmem>>, %arg5: memref<32x128xbf16, #tpu.memory_space<vmem>>, %arg6: memref<1x32xf32, #tpu.memory_space<vmem>>, %arg7: memref<1x32xf32, #tpu.memory_space<vmem>>, %arg8: memref<1x32xf32, #tpu.memory_space<vmem>>, %arg9: memref<1x32xf32, #tpu.memory_space<vmem>>, %arg10: memref<1x128xf32, #tpu.memory_space<vmem>>, %arg11: memref<1x128xf32, #tpu.memory_space<vmem>>, %arg12: memref<1x8x16x128xf32, #tpu.memory_space<vmem>>) attributes {dimension_semantics = [#tpu.dimension_semantics<parallel>, #tpu.dimension_semantics<parallel>], iteration_bounds = array<i64: 2, 2>, scalar_prefetch = 0 : i64, scratch_operands = 0 : i64, tpu.core_type = #tpu.core_type<tc>, window_params = [{transform_indices = @transform_0, window_bounds = array<i64: 1, 18, 18, 128>}, {pipeline_mode = #tpu.pipeline_mode<synchronous>, transform_indices = @transform_1, window_bounds = array<i64: 128, 32>}, {pipeline_mode = #tpu.pipeline_mode<synchronous>, transform_indices = @transform_2, window_bounds = array<i64: 288, 32>}, {pipeline_mode = #tpu.pipeline_mode<synchronous>, transform_indices = @transform_3, window_bounds = array<i64: 32, 128>}, {pipeline_mode = #tpu.pipeline_mode<synchronous>, transform_indices = @transform_4, window_bounds = array<i64: 1, 32>}, {pipeline_mode = #tpu.pipeline_mode<synchronous>, transform_indices = @transform_5, window_bounds = array<i64: 1, 32>}, {pipeline_mode = #tpu.pipeline_mode<synchronous>, transform_indices = @transform_6, window_bounds = array<i64: 1, 32>}, {pipeline_mode = #tpu.pipeline_mode<synchronous>, transform_indices = @transform_7, window_bounds = array<i64: 1, 32>}, {pipeline_mode = #tpu.pipeline_mode<synchronous>, transform_indices = @transform_8, window_bounds = array<i64: 1, 128>}, {pipeline_mode = #tpu.pipeline_mode<synchronous>, transform_indices = @transform_9, window_bounds = array<i64: 1, 128>}, {transform_indices = @transform_10, window_bounds = array<i64: 1, 8, 16, 128>}]} {
    %c8_i32 = arith.constant 8 : i32
    %0 = arith.muli %arg1, %c8_i32 : i32
    %1 = tpu.assume_multiple %0, 8 : i32
    %c0 = arith.constant 0 : index
    %2 = arith.index_cast %1 : i32 to index
    %c0_0 = arith.constant 0 : index
    %c0_1 = arith.constant 0 : index
    %3 = vector.load %arg2[%c0, %2, %c0_0, %c0_1] : memref<1x18x18x128xf32, #tpu.memory_space<vmem>>, vector<1x10x18x128xf32>
    %4 = vector.shape_cast %3 : vector<1x10x18x128xf32> to vector<10x18x128xf32>
    %5 = vector.shape_cast %4 : vector<10x18x128xf32> to vector<180x128xf32>
    %6 = arith.truncf %5 : vector<180x128xf32> to vector<180x128xbf16>
    %c0_2 = arith.constant 0 : index
    %c0_3 = arith.constant 0 : index
    %7 = vector.load %arg3[%c0_2, %c0_3] : memref<128x32xbf16, #tpu.memory_space<vmem>>, vector<128x32xbf16>
    %cst = arith.constant dense<0.000000e+00> : vector<180x32xf32>
    %8 = tpu.matmul %6, %7, %cst {dimension_numbers = #tpu.dot_dimension_numbers<[1], [0], [0], [1], [0, 0, 1, 1], [], []>} : vector<180x128xbf16>, vector<128x32xbf16>, vector<180x32xf32> -> vector<180x32xf32>
    %c0_4 = arith.constant 0 : index
    %c0_5 = arith.constant 0 : index
    %9 = vector.load %arg6[%c0_4, %c0_5] : memref<1x32xf32, #tpu.memory_space<vmem>>, vector<1x32xf32>
    %10 = vector.shape_cast %9 : vector<1x32xf32> to vector<32xf32>
    %11 = vector.shape_cast %10 : vector<32xf32> to vector<1x32xf32>
    %12 = vector.broadcast %11 : vector<1x32xf32> to vector<180x32xf32>
    %13 = arith.mulf %8, %12 : vector<180x32xf32>
    %c0_6 = arith.constant 0 : index
    %c0_7 = arith.constant 0 : index
    %14 = vector.load %arg7[%c0_6, %c0_7] : memref<1x32xf32, #tpu.memory_space<vmem>>, vector<1x32xf32>
    %15 = vector.shape_cast %14 : vector<1x32xf32> to vector<32xf32>
    %16 = vector.shape_cast %15 : vector<32xf32> to vector<1x32xf32>
    %17 = vector.broadcast %16 : vector<1x32xf32> to vector<180x32xf32>
    %18 = arith.addf %13, %17 : vector<180x32xf32>
    %cst_8 = arith.constant 0.000000e+00 : f32
    %19 = vector.broadcast %cst_8 : f32 to vector<180x32xf32>
    %20 = arith.maximumf %18, %19 : vector<180x32xf32>
    %21 = vector.shape_cast %20 : vector<180x32xf32> to vector<10x18x32xf32>
    %22 = tpu.iota {dimensions = array<i32: 0>} : vector<10x18x32xi32>
    %23 = vector.broadcast %1 : i32 to vector<10x18x32xi32>
    %24 = arith.addi %22, %23 : vector<10x18x32xi32>
    %25 = tpu.iota {dimensions = array<i32: 1>} : vector<10x18x32xi32>
    %c1_i32 = arith.constant 1 : i32
    %26 = vector.broadcast %c1_i32 : i32 to vector<10x18x32xi32>
    %27 = arith.cmpi sge, %24, %26 : vector<10x18x32xi32>
    %c16_i32 = arith.constant 16 : i32
    %28 = vector.broadcast %c16_i32 : i32 to vector<10x18x32xi32>
    %29 = arith.cmpi sle, %24, %28 : vector<10x18x32xi32>
    %30 = arith.andi %27, %29 : vector<10x18x32xi1>
    %c1_i32_9 = arith.constant 1 : i32
    %31 = vector.broadcast %c1_i32_9 : i32 to vector<10x18x32xi32>
    %32 = arith.cmpi sge, %25, %31 : vector<10x18x32xi32>
    %33 = arith.andi %30, %32 : vector<10x18x32xi1>
    %c16_i32_10 = arith.constant 16 : i32
    %34 = vector.broadcast %c16_i32_10 : i32 to vector<10x18x32xi32>
    %35 = arith.cmpi sle, %25, %34 : vector<10x18x32xi32>
    %36 = arith.andi %33, %35 : vector<10x18x32xi1>
    %cst_11 = arith.constant 0.000000e+00 : f32
    %37 = vector.broadcast %cst_11 : f32 to vector<10x18x32xf32>
    %38 = arith.select %36, %21, %37 : vector<10x18x32xi1>, vector<10x18x32xf32>
    %39 = arith.truncf %38 : vector<10x18x32xf32> to vector<10x18x32xbf16>
    %40 = vector.extract_strided_slice %39 {offsets = [0, 0, 0], sizes = [8, 16, 32], strides = [1, 1, 1]} : vector<10x18x32xbf16> to vector<8x16x32xbf16>
    %41 = vector.extract_strided_slice %39 {offsets = [0, 1, 0], sizes = [8, 16, 32], strides = [1, 1, 1]} : vector<10x18x32xbf16> to vector<8x16x32xbf16>
    %42 = vector.extract_strided_slice %39 {offsets = [0, 2, 0], sizes = [8, 16, 32], strides = [1, 1, 1]} : vector<10x18x32xbf16> to vector<8x16x32xbf16>
    %43 = vector.extract_strided_slice %39 {offsets = [1, 0, 0], sizes = [8, 16, 32], strides = [1, 1, 1]} : vector<10x18x32xbf16> to vector<8x16x32xbf16>
    %44 = vector.extract_strided_slice %39 {offsets = [1, 1, 0], sizes = [8, 16, 32], strides = [1, 1, 1]} : vector<10x18x32xbf16> to vector<8x16x32xbf16>
    %45 = vector.extract_strided_slice %39 {offsets = [1, 2, 0], sizes = [8, 16, 32], strides = [1, 1, 1]} : vector<10x18x32xbf16> to vector<8x16x32xbf16>
    %46 = vector.extract_strided_slice %39 {offsets = [2, 0, 0], sizes = [8, 16, 32], strides = [1, 1, 1]} : vector<10x18x32xbf16> to vector<8x16x32xbf16>
    %47 = vector.extract_strided_slice %39 {offsets = [2, 1, 0], sizes = [8, 16, 32], strides = [1, 1, 1]} : vector<10x18x32xbf16> to vector<8x16x32xbf16>
    %48 = vector.extract_strided_slice %39 {offsets = [2, 2, 0], sizes = [8, 16, 32], strides = [1, 1, 1]} : vector<10x18x32xbf16> to vector<8x16x32xbf16>
    %49 = tpu.concatenate %40, %41, %42, %43, %44, %45, %46, %47, %48 in 2 : vector<8x16x32xbf16>, vector<8x16x32xbf16>, vector<8x16x32xbf16>, vector<8x16x32xbf16>, vector<8x16x32xbf16>, vector<8x16x32xbf16>, vector<8x16x32xbf16>, vector<8x16x32xbf16>, vector<8x16x32xbf16> -> vector<8x16x288xbf16>
    %50 = vector.shape_cast %49 : vector<8x16x288xbf16> to vector<128x288xbf16>
    %c0_12 = arith.constant 0 : index
    %c0_13 = arith.constant 0 : index
    %51 = vector.load %arg4[%c0_12, %c0_13] : memref<288x32xbf16, #tpu.memory_space<vmem>>, vector<288x32xbf16>
    %cst_14 = arith.constant dense<0.000000e+00> : vector<128x32xf32>
    %52 = tpu.matmul %50, %51, %cst_14 {dimension_numbers = #tpu.dot_dimension_numbers<[1], [0], [0], [1], [0, 0, 1, 1], [], []>} : vector<128x288xbf16>, vector<288x32xbf16>, vector<128x32xf32> -> vector<128x32xf32>
    %c0_15 = arith.constant 0 : index
    %c0_16 = arith.constant 0 : index
    %53 = vector.load %arg8[%c0_15, %c0_16] : memref<1x32xf32, #tpu.memory_space<vmem>>, vector<1x32xf32>
    %54 = vector.shape_cast %53 : vector<1x32xf32> to vector<32xf32>
    %55 = vector.shape_cast %54 : vector<32xf32> to vector<1x32xf32>
    %56 = vector.broadcast %55 : vector<1x32xf32> to vector<128x32xf32>
    %57 = arith.mulf %52, %56 : vector<128x32xf32>
    %c0_17 = arith.constant 0 : index
    %c0_18 = arith.constant 0 : index
    %58 = vector.load %arg9[%c0_17, %c0_18] : memref<1x32xf32, #tpu.memory_space<vmem>>, vector<1x32xf32>
    %59 = vector.shape_cast %58 : vector<1x32xf32> to vector<32xf32>
    %60 = vector.shape_cast %59 : vector<32xf32> to vector<1x32xf32>
    %61 = vector.broadcast %60 : vector<1x32xf32> to vector<128x32xf32>
    %62 = arith.addf %57, %61 : vector<128x32xf32>
    %cst_19 = arith.constant 0.000000e+00 : f32
    %63 = vector.broadcast %cst_19 : f32 to vector<128x32xf32>
    %64 = arith.maximumf %62, %63 : vector<128x32xf32>
    %65 = arith.truncf %64 : vector<128x32xf32> to vector<128x32xbf16>
    %c0_20 = arith.constant 0 : index
    %c0_21 = arith.constant 0 : index
    %66 = vector.load %arg5[%c0_20, %c0_21] : memref<32x128xbf16, #tpu.memory_space<vmem>>, vector<32x128xbf16>
    %cst_22 = arith.constant dense<0.000000e+00> : vector<128x128xf32>
    %67 = tpu.matmul %65, %66, %cst_22 {dimension_numbers = #tpu.dot_dimension_numbers<[1], [0], [0], [1], [0, 0, 1, 1], [], []>} : vector<128x32xbf16>, vector<32x128xbf16>, vector<128x128xf32> -> vector<128x128xf32>
    %c0_23 = arith.constant 0 : index
    %c0_24 = arith.constant 0 : index
    %68 = vector.load %arg10[%c0_23, %c0_24] : memref<1x128xf32, #tpu.memory_space<vmem>>, vector<1x128xf32>
    %69 = vector.shape_cast %68 : vector<1x128xf32> to vector<128xf32>
    %70 = vector.shape_cast %69 : vector<128xf32> to vector<1x128xf32>
    %71 = vector.broadcast %70 : vector<1x128xf32> to vector<128x128xf32>
    %72 = arith.mulf %67, %71 : vector<128x128xf32>
    %c0_25 = arith.constant 0 : index
    %c0_26 = arith.constant 0 : index
    %73 = vector.load %arg11[%c0_25, %c0_26] : memref<1x128xf32, #tpu.memory_space<vmem>>, vector<1x128xf32>
    %74 = vector.shape_cast %73 : vector<1x128xf32> to vector<128xf32>
    %75 = vector.shape_cast %74 : vector<128xf32> to vector<1x128xf32>
    %76 = vector.broadcast %75 : vector<1x128xf32> to vector<128x128xf32>
    %77 = arith.addf %72, %76 : vector<128x128xf32>
    %78 = vector.extract_strided_slice %4 {offsets = [1, 1, 0], sizes = [8, 16, 128], strides = [1, 1, 1]} : vector<10x18x128xf32> to vector<8x16x128xf32>
    %79 = vector.shape_cast %78 : vector<8x16x128xf32> to vector<128x128xf32>
    %80 = arith.addf %77, %79 : vector<128x128xf32>
    %cst_27 = arith.constant 0.000000e+00 : f32
    %81 = vector.broadcast %cst_27 : f32 to vector<128x128xf32>
    %82 = arith.maximumf %80, %81 : vector<128x128xf32>
    %83 = vector.shape_cast %82 : vector<128x128xf32> to vector<8x16x128xf32>
    %c0_28 = arith.constant 0 : index
    %c0_29 = arith.constant 0 : index
    %c0_30 = arith.constant 0 : index
    %c0_31 = arith.constant 0 : index
    %84 = vector.load %arg12[%c0_28, %c0_29, %c0_30, %c0_31] : memref<1x8x16x128xf32, #tpu.memory_space<vmem>>, vector<1x8x16x128xf32>
    %85 = vector.shape_cast %84 : vector<1x8x16x128xf32> to vector<8x16x128xf32>
    %86 = vector.shape_cast %83 : vector<8x16x128xf32> to vector<1x8x16x128xf32>
    tpu.vector_store %arg12[%c0_28, %c0_29, %c0_30, %c0_31], %86 {strides = array<i32>} : memref<1x8x16x128xf32, #tpu.memory_space<vmem>>, vector<1x8x16x128xf32>,
    return
  }
  func.func @transform_0(%arg0: i32, %arg1: i32) -> (i32, i32, i32, i32) {
    %c0_i32 = arith.constant 0 : i32
    %c0_i32_0 = arith.constant 0 : i32
    %c0_i32_1 = arith.constant 0 : i32
    %c0_i32_2 = arith.constant 0 : i32
    return %arg0, %c0_i32, %c0_i32_0, %c0_i32_1 : i32, i32, i32, i32
  }
  func.func @transform_1(%arg0: i32, %arg1: i32) -> (i32, i32) {
    %c0_i32 = arith.constant 0 : i32
    %c0_i32_0 = arith.constant 0 : i32
    %c0_i32_1 = arith.constant 0 : i32
    return %c0_i32, %c0_i32_0 : i32, i32
  }
  func.func @transform_2(%arg0: i32, %arg1: i32) -> (i32, i32) {
    %c0_i32 = arith.constant 0 : i32
    %c0_i32_0 = arith.constant 0 : i32
    %c0_i32_1 = arith.constant 0 : i32
    return %c0_i32, %c0_i32_0 : i32, i32
  }
  func.func @transform_3(%arg0: i32, %arg1: i32) -> (i32, i32) {
    %c0_i32 = arith.constant 0 : i32
    %c0_i32_0 = arith.constant 0 : i32
    %c0_i32_1 = arith.constant 0 : i32
    return %c0_i32, %c0_i32_0 : i32, i32
  }
  func.func @transform_4(%arg0: i32, %arg1: i32) -> (i32, i32) {
    %c0_i32 = arith.constant 0 : i32
    %c0_i32_0 = arith.constant 0 : i32
    %c0_i32_1 = arith.constant 0 : i32
    return %c0_i32, %c0_i32_0 : i32, i32
  }
  func.func @transform_5(%arg0: i32, %arg1: i32) -> (i32, i32) {
    %c0_i32 = arith.constant 0 : i32
    %c0_i32_0 = arith.constant 0 : i32
    %c0_i32_1 = arith.constant 0 : i32
    return %c0_i32, %c0_i32_0 : i32, i32
  }
  func.func @transform_6(%arg0: i32, %arg1: i32) -> (i32, i32) {
    %c0_i32 = arith.constant 0 : i32
    %c0_i32_0 = arith.constant 0 : i32
    %c0_i32_1 = arith.constant 0 : i32
    return %c0_i32, %c0_i32_0 : i32, i32
  }
  func.func @transform_7(%arg0: i32, %arg1: i32) -> (i32, i32) {
    %c0_i32 = arith.constant 0 : i32
    %c0_i32_0 = arith.constant 0 : i32
    %c0_i32_1 = arith.constant 0 : i32
    return %c0_i32, %c0_i32_0 : i32, i32
  }
  func.func @transform_8(%arg0: i32, %arg1: i32) -> (i32, i32) {
    %c0_i32 = arith.constant 0 : i32
    %c0_i32_0 = arith.constant 0 : i32
    %c0_i32_1 = arith.constant 0 : i32
    return %c0_i32, %c0_i32_0 : i32, i32
  }
  func.func @transform_9(%arg0: i32, %arg1: i32) -> (i32, i32) {
    %c0_i32 = arith.constant 0 : i32
    %c0_i32_0 = arith.constant 0 : i32
    %c0_i32_1 = arith.constant 0 : i32
    return %c0_i32, %c0_i32_0 : i32, i32
  }
  func.func @transform_10(%arg0: i32, %arg1: i32) -> (i32, i32, i32, i32) {
    %c0_i32 = arith.constant 0 : i32
    %c0_i32_0 = arith.constant 0 : i32
    %c0_i32_1 = arith.constant 0 : i32
    return %arg0, %arg1, %c0_i32, %c0_i32_0 : i32, i32, i32, i32
  }
}

</mosaic_0001>

<bundles_post_ra>
// kernel: tpu_custom_call.1
= control target key start
LH: loop header
LB: loop body
LE: loop exit
PB: predicated region body
PF: predicated region fallthrough
CT: control target
= control target key end

     0   :  { %15 = vsyncpa [#allocation3], 0  ;;  %s5808_s0 = inlined_call_operand.vmem [shape: f32[2,18,18,128], index: 0, kind: input, shape index: {}]   ;;  %s5809_s1 = inlined_call_operand.vmem [shape: bf16[128,32], index: 1, kind: input, shape index: {}]   ;;  %s5810_s2 = inlined_call_operand.vmem [shape: bf16[288,32], index: 2, kind: input, shape index: {}]   ;;  %s5811_s3 = inlined_call_operand.vmem [shape: bf16[32,128], index: 3, kind: input, shape index: {}]   ;;  %s5812_s4 = inlined_call_operand.vmem [shape: f32[1,32], index: 4, kind: input, shape index: {}]   ;;  %s5813_s5 = inlined_call_operand.vmem [shape: f32[1,32], index: 5, kind: input, shape index: {}]   ;;  %s5814_s6 = inlined_call_operand.vmem [shape: f32[1,32], index: 6, kind: input, shape index: {}]   ;;  %s5815_s7 = inlined_call_operand.vmem [shape: f32[1,32], index: 7, kind: input, shape index: {}]   ;;  %s5816_s8 = inlined_call_operand.vmem [shape: f32[1,128], index: 8, kind: input, shape index: {}]   ;;  %s5817_s9 = inlined_call_operand.vmem [shape: f32[1,128], index: 9, kind: input, shape index: {}]   ;;  %s5818_s10 = inlined_call_operand.hbm [shape: f32[2,16,16,128], index: 10, kind: output, shape index: {}]  }
   0x1   :  { %17 = vsyncpa [#allocation3 + $0x1], 0  ;;  %s4335_s13 = smov 0   ;;  %s4337_s14 = smov 0  }
   0x2   :  { %s4339_s15 = smov 0   ;;  %s4341_s16 = smov 0  }
   0x3   :  { %s4343_s17 = smov 0   ;;  %s4345_s18 = smov 0  }
   0x4   :  { %s4347_s19 = smov 0   ;;  %s4349_s20 = smov 0  }
   0x5 LB: > { %5823 = sst [smem:[#allocation5_spill]] %s4263_s18  ;;  %s3750_s21 = sadd.s32 4294967295, %s4271_s20   ;;  %s4271_s20 = sphi %s4349_s20, %s23_s20   ;;  %s4267_s19 = sphi %s4347_s19, %s5878_s19   ;;  %s4263_s18 = sphi %s4345_s18, %s5877_s18   ;;  %s4259_s17 = sphi %s4343_s17, %s5876_s17   ;;  %s4255_s16 = sphi %s4341_s16, %s5875_s16   ;;  %s4251_s15 = sphi %s4339_s15, %s5881_s15   ;;  %s4247_s14 = sphi %s4337_s14, %s5880_s14   ;;  %s4243_s13 = sphi %s4335_s13, %s5879_s13  }
   0x6   : > { %5824 = sst [smem:[#allocation6_spill]] %s4267_s19  ;;  %s3751_s22 = sadd.s32 4294967294, %s4271_s20  }
   0x7   : > { %s32_s23 = sadd.s32 1, %s4263_s18  ;;  %s35_s24 = sadd.s32 1, %s4267_s19 }
   0x8   : > { %p33_p0 = scmp.ge.s32.totalorder %s32_s23, 2  ;;  %p269_p1 = scmp.ne.s32.totalorder %s4251_s15, %s4247_s14 }
   0x9   : > { %p270_p2 = scmp.eq.s32.totalorder %s3750_s21, 3  ;;  %p275_p5 = scmp.ne.s32.totalorder %s4247_s14, %s4243_s13 }
   0xa   : > { %s5883_s23 = smov (%p33_p0, %s32_s23), 0  ;;  %s5885_s24 = smov (!%p33_p0, %s35_s24), %s4267_s19 }
   0xb   : > { %5825 = sst [smem:[#allocation7_spill]] %s5883_s23  ;;  %s255_s25 = ssub.s32 %s4263_s18, %s5883_s23 }
   0xc   : > { %p4386_p3 = por %p270_p2, %p269_p1  ;;  %p37_p4 = scmp.ge.s32.totalorder %s5885_s24, 2 }
   0xd   : > { %p276_p6 = scmp.eq.s32.totalorder %s3751_s22, 3  ;;  %p3754_p7 = scmp.ge.s32.totalorder %s4271_s20, 1 }
   0xe   : > { %s5887_s24 = smov (%p37_p4, %s5885_s24), 0  ;;  %p329_p9 = scmp.lt.s32.totalorder %s4271_s20, 5 }
   0xf   : > { %5827 = sst [smem:[#allocation8_spill]] %s5887_s24  ;;  %p4395_p8 = por %p276_p6, %p275_p5 }
  0x10   : > { %s254_s28 = ssub.s32 %s4267_s19, %s5887_s24  ;;  %s259_s29 = sadd.s32 1, %s4251_s15 }
  0x11   : > { %s256_s30 = sor.u32 %s255_s25, %s254_s28  ;;  %p330_p10 = pnand %p3754_p7, %p329_p9 }
  0x12   : > { %p257_p11 = scmp.eq.s32.totalorder %s256_s30, 0  ;;  %v4097_v0 = vld [vmem:[%s5809_s1] sm:$0xff] (!%p330_p10)   ;;  %p367_p12 = scmp.lt.s32.totalorder (!%p330_p10), %s4259_s17, 1  ;;  %v4098_v1 = vld [vmem:[%s5809_s1 + $0x8] sm:$0xff] (!%p330_p10)   ;;  %v4099_v2 = vld [vmem:[%s5809_s1 + $0x10] sm:$0xff] (!%p330_p10)   ;;  %v441_v3 = vlaneseq (!%p330_p10) }
  0x13   : > { %333 = sbr.rel (%p330_p10) target bundleno = 1003 (0x3eb), region = 60  ;;  %3923 = vmatprep.subr.bf16.mxu0 (!%p330_p10), %v4097_v0  ;;  %v4100_v4 = vld [vmem:[%s5809_s1 + $0x18] sm:$0xff] (!%p330_p10)   ;;  %v4273_v7 = vmov (!%p330_p10), 1983009808   ;;  %v4101_v14 = vld [vmem:[%s5809_s1 + $0x20] sm:$0xff] (!%p330_p10)   ;;  %v4102_v40 = vld [vmem:[%s5809_s1 + $0x28] sm:$0xff] (!%p330_p10)  }
  0x14   : > { %s4404_s11 = scalar_select %p257_p11, %s4251_s15, %s259_s29  }
  0x15   : > { %3924 = vmatpush3.bf16.msra.mxu0 (!%p330_p10), %v4097_v0  ;;  %s3758_s25 = smul.u32 (!%p330_p10), 192, %s4255_s16  ;;  %v439_v8 = vunpack.c.l.s4 (!%p330_p10), %v4273_v7  ;;  %v4428_v9 = vshrl.u32 (!%p330_p10), %v441_v3, 7  ;;  %v4103_v49 = vld [vmem:[%s5809_s1 + $0x30] sm:$0xff] (!%p330_p10)   ;;  %s4274_s22 = smov (!%p330_p10), 96  }
  0x16   : > { %3925 = vmatprep.subr.bf16.mxu0 (!%p330_p10), %v4098_v1  ;;  %s4275_s23 = smov (!%p330_p10), 64   ;;  %s3818_s28 = sshll.u32 (!%p330_p10), %s4255_s16, 4 }
  0x17   : > { %v440_v16 = vunpack.c.0.s8 (!%p330_p10), %v439_v8  ;;  %vm1988_vm4 = vcmp.ge.s32.totalorder (!%p330_p10), %v4428_v9, 1  ;;  %s3814_s29 = sshll.u32 (!%p330_p10), %s4259_s17, 5 }
  0x19   : > { %3926 = vmatpush3.bf16.msra.mxu0 (!%p330_p10), %v4098_v1  ;;  %v4456_v25 = vsub.s32 (!%p330_p10), %v440_v16, %v4428_v9 }
  0x1a   : > { %s368_s24 = scalar_select %p367_p12, %s4259_s17, 1  ;;  %3927 = vmatprep.subr.bf16.mxu0 %v4099_v2 }
  0x1c   : > { %s4019_s30 = smul.u32 432, %s368_s24 }
  0x1d   : > { %3928 = vmatpush3.bf16.msra.mxu0 %v4099_v2 }
  0x1e   : > { %s371_s19 = scalar_lea.vmem %s5808_s0, %s4019_s30  ;;  %3929 = vmatprep.subr.bf16.mxu0 %v4100_v4 }
  0x1f   : > { %s4421_s18 = scalar_lea.vmem %s371_s19, %s3758_s25  ;;  %s3757_s25 = sshll.u32 %s4255_s16, 3 }
  0x20   : > { %v377_v5 = vld [vmem:[%s4421_s18] sm:$0xff]  ;;  %v378_v6 = vld [vmem:[%s4421_s18 + $0x8] sm:$0xff]  ;;  %v380_v10 = vld [vmem:[%s4421_s18 + $0x18] sm:$0xff]  ;;  %s4276_s19 = smov 32   ;;  %s3669_s16 = sadd.s32 %s3818_s28, %s3814_s29 }
  0x21   : > { %v381_v11 = vld [vmem:[%s4421_s18 + $0x20] sm:$0xff]  ;;  %v4433_v12 = vld [vmem:[%s4421_s18 + $0x30] sm:$0xff]  ;;  %v4436_v13 = vld [vmem:[%s4421_s18 + $0x38] sm:$0xff]  ;;  %v437_v15 = vcombine.high %v377_v5, %v377_v5  ;;  %v454_v17 = vcombine.high %v378_v6, %v378_v6  ;;  %v478_v19 = vcombine.high %v380_v10, %v380_v10  ;;  %3930 = vmatpush3.bf16.msra.mxu0 %v4100_v4  ;;  %v444_v35 = vrot.slane %v377_v5, %v4456_v25  ;;  %s3815_s17 = sshll.u32 %s3669_s16, 7 }
  0x22   : > { %v4442_v18 = vld [vmem:[%s4421_s18 + $0x48] sm:$0xff]  ;;  %v495_v20 = vcombine.high %v381_v11, %v381_v11  ;;  %v519_v21 = vcombine.high %v4433_v12, %v4433_v12  ;;  %v4447_v22 = vld [vmem:[%s4421_s18 + $0x50] sm:$0xff]  ;;  %v4450_v23 = vld [vmem:[%s4421_s18 + $0x60] sm:$0xff]  ;;  %v536_v26 = vcombine.high %v4436_v13, %v4436_v13  ;;  %v461_v37 = vrot.slane %v378_v6, %v4456_v25  ;;  %3931 = vmatprep.subr.bf16.mxu0 %v4101_v14  ;;  %s5747_s21 = scalar_lea.hbm %s5818_s10, %s3815_s17 }
  0x23   : > { %v4453_v24 = vld [vmem:[%s4421_s18 + $0x68] sm:$0xff]  ;;  %v560_v27 = vcombine.high %v4442_v18, %v4442_v18  ;;  %v577_v28 = vcombine.high %v4447_v22, %v4447_v22  ;;  %v4465_v29 = vld [vmem:[%s4421_s18 + $0x78] sm:$0xff]  ;;  %v4468_v30 = vld [vmem:[%s4421_s18 + $0x80] sm:$0xff]  ;;  %v601_v31 = vcombine.high %v4450_v23, %v4450_v23  ;;  %v451_v36 = vrot.slane %v437_v15, %v4456_v25 }
  0x24   : > { %v618_v32 = vcombine.high %v4453_v24, %v4453_v24  ;;  %v642_v33 = vcombine.high %v4465_v29, %v4465_v29  ;;  %v659_v34 = vcombine.high %v4468_v30, %v4468_v30  ;;  %v468_v38 = vrot.slane %v454_v17, %v4456_v25  ;;  %v3759_v39 = vld.sshfl [vmem:[%s4421_s18 + $0x10] sm:$0x3 pattern:$0x76325410]  ;;  %v4104_v4 = vld [vmem:[%s5809_s1 + $0x38] sm:$0xff]  }
  0x25   : > { %v485_v41 = vrot.slane %v380_v10, %v4456_v25  ;;  %v492_v42 = vrot.slane %v478_v19, %v4456_v25  ;;  %v502_v43 = vrot.slane %v381_v11, %v4456_v25  ;;  %v509_v44 = vrot.slane %v495_v20, %v4456_v25  ;;  %v4169_v54 = vld.sshfl [vmem:[%s4421_s18 + $0x28] sm:$0x3 pattern:$0x76325410]  ;;  %3932 = vmatpush3.bf16.msra.mxu0 %v4101_v14 }
  0x26   : > { %v452_v45 = vcombine.high %v444_v35, %v444_v35  ;;  %v453_v46 = vcombine.high %v451_v36, %v451_v36  ;;  %v469_v47 = vcombine.high %v461_v37, %v461_v37  ;;  %v470_v48 = vcombine.high %v468_v38, %v468_v38  ;;  %3933 = vmatprep.subr.bf16.mxu0 %v4102_v40  ;;  %v4170_v3 = vld.sshfl [vmem:[%s4421_s18 + $0x40] sm:$0x3 pattern:$0x76325410] }
  0x27   : > { %v493_v50 = vcombine.high %v485_v41, %v485_v41  ;;  %v494_v51 = vcombine.high %v492_v42, %v492_v42  ;;  %v510_v52 = vcombine.high %v502_v43, %v502_v43  ;;  %v881_v53 = vcombine.low %v3759_v39, %v485_v41 }
  0x28   : > { %v847_v55 = vcombine.low %v444_v35, %v452_v45  ;;  %v848_v56 = vcombine.low %v451_v36, %v453_v46  ;;  %v864_v57 = vcombine.low %v461_v37, %v469_v47  ;;  %v865_v58 = vcombine.low %v468_v38, %v470_v48 }
  0x29   : > { %v882_v59 = vcombine.low %v493_v50, %v492_v42  ;;  %v889_v60 = vrot.slane %v881_v53, %v4456_v25  ;;  %v898_v61 = vcombine.low %v494_v51, %v502_v43  ;;  %v899_v62 = vcombine.low %v510_v52, %v509_v44  ;;  %3934 = vmatpush3.bf16.msra.mxu0 %v4102_v40 }
  0x2a   : > { %v855_v63 = vrot.slane %v847_v55, %v4456_v25  ;;  %v862_v0 = vrot.slane %v848_v56, %v4456_v25  ;;  %v872_v1 = vrot.slane %v864_v57, %v4456_v25  ;;  %v879_v2 = vrot.slane %v865_v58, %v4456_v25  ;;  %3935 = vmatprep.subr.bf16.mxu0 %v4103_v49 }
  0x2b   : > { %v896_v5 = vrot.slane %v882_v59, %v4456_v25  ;;  %v906_v6 = vrot.slane %v898_v61, %v4456_v25  ;;  %v913_v7 = vrot.slane %v899_v62, %v4456_v25  ;;  %v511_v8 = vcombine.high %v509_v44, %v509_v44 }
  0x2c   : > { %v863_v10 = vcombine.low %v855_v63, %v862_v0  ;;  %v880_v11 = vcombine.low %v872_v1, %v879_v2  ;;  %v526_v14 = vrot.slane %v4433_v12, %v4456_v25  ;;  %v533_v17 = vrot.slane %v519_v21, %v4456_v25  ;;  %v4172_v0 = vld.sshfl [vmem:[%s4421_s18 + $0x70] sm:$0x3 pattern:$0x76325410] }
  0x2d   : > { %v897_v15 = vcombine.low %v889_v60, %v896_v5  ;;  %v914_v16 = vcombine.low %v906_v6, %v913_v7  ;;  %v543_v19 = vrot.slane %v4436_v13, %v4456_v25  ;;  %v915_v36 = vcombine.low %v511_v8, %v4169_v54  ;;  %3936 = vmatpush3.bf16.msra.mxu0 %v4103_v49 }
  0x2e   : > { %v1252_v20 = vpack.c.bf16 %v880_v11, %v863_v10  ;;  %v534_v35 = vcombine.high %v526_v14, %v526_v14  ;;  %v550_v37 = vrot.slane %v536_v26, %v4456_v25  ;;  %v535_v39 = vcombine.high %v533_v17, %v533_v17  ;;  %3937 = vmatprep.subr.bf16.mxu0 %v4104_v4  ;;  %v4171_v26 = vld.sshfl [vmem:[%s4421_s18 + $0x58] sm:$0x3 pattern:$0x76325410] }
  0x2f   : > { %v1253_v38 = vpack.c.bf16 %v914_v16, %v897_v15  ;;  %v551_v40 = vcombine.high %v543_v19, %v543_v19  ;;  %v923_v12 = vrot.slane %v915_v36, %v4456_v25  ;;  %v567_v44 = vrot.slane %v4442_v18, %v4456_v25 }
  0x30   : > { %3939 = vmatprep.mubr.bf16.mxu0 %v1252_v20  ;;  %v916_v41 = vcombine.low %v526_v14, %v534_v35  ;;  %v552_v21 = vcombine.high %v550_v37, %v550_v37  ;;  %v932_v42 = vcombine.low %v533_v17, %v535_v39  ;;  %v574_v13 = vrot.slane %v560_v27, %v4456_v25 }
  0x31   : > { %v933_v43 = vcombine.low %v543_v19, %v551_v40  ;;  %v584_v46 = vrot.slane %v4447_v22, %v4456_v25  ;;  %v591_v48 = vrot.slane %v577_v28, %v4456_v25  ;;  %v575_v51 = vcombine.high %v567_v44, %v567_v44  ;;  %3938 = vmatpush3.bf16.msra.mxu0 %v4104_v4  ;;  %v395_v40 = vld [vmem:[%s4421_s18 + $0x90] sm:$0xff] }
  0x32   : > { %v930_v45 = vrot.slane %v916_v41, %v4456_v25  ;;  %v949_v47 = vcombine.low %v550_v37, %v552_v21  ;;  %v940_v49 = vrot.slane %v932_v42, %v4456_v25  ;;  %v576_v52 = vcombine.high %v574_v13, %v574_v13 }
  0x33   : > { %v947_v50 = vrot.slane %v933_v43, %v4456_v25  ;;  %v950_v27 = vcombine.low %v4170_v3, %v567_v44  ;;  %v592_v54 = vcombine.high %v584_v46, %v584_v46  ;;  %v966_v56 = vcombine.low %v575_v51, %v574_v13  ;;  %v396_v44 = vld [vmem:[%s4421_s18 + $0x98] sm:$0xff] }
  0x34   : > { %v931_v18 = vcombine.low %v923_v12, %v930_v45  ;;  %v957_v53 = vrot.slane %v949_v47, %v4456_v25  ;;  %v967_v57 = vcombine.low %v576_v52, %v584_v46  ;;  %v593_v58 = vcombine.high %v591_v48, %v591_v48  ;;  %3940 = vmatmul.mubr.bf16.vlgmr.msra.gmra.mrb[0].mxu0 %v1253_v38  ;;  %v4173_v38 = vld.sshfl [vmem:[%s4421_s18 + $0x88] sm:$0x3 pattern:$0x76325410] }
  0x35   : > { %v948_v55 = vcombine.low %v940_v49, %v947_v50  ;;  %v964_v22 = vrot.slane %v950_v27, %v4456_v25  ;;  %v608_v28 = vrot.slane %v4450_v23, %v4456_v25  ;;  %v615_v59 = vrot.slane %v601_v31, %v4456_v25  ;;  %v4174_v50 = vld.sshfl [vmem:[%s4421_s18 + $0xa0] sm:$0x3 pattern:$0x76325410] }
  0x36   : > { %v974_v61 = vrot.slane %v966_v56, %v4456_v25  ;;  %v981_v62 = vrot.slane %v967_v57, %v4456_v25  ;;  %v983_v63 = vcombine.low %v592_v54, %v591_v48  ;;  %v984_v4 = vcombine.low %v593_v58, %v4171_v26  ;;  %v398_v54 = vld [vmem:[%s4421_s18 + $0xa8] sm:$0xff] }
  0x37   : > { %v1254_v60 = vpack.c.bf16 %v948_v55, %v931_v18  ;;  %v965_v1 = vcombine.low %v957_v53, %v964_v22  ;;  %v616_v2 = vcombine.high %v608_v28, %v608_v28  ;;  %v617_v3 = vcombine.high %v615_v59, %v615_v59 }
  0x38   : > { %v982_v5 = vcombine.low %v974_v61, %v981_v62  ;;  %v991_v6 = vrot.slane %v983_v63, %v4456_v25  ;;  %v625_v23 = vrot.slane %v4453_v24, %v4456_v25  ;;  %v632_v31 = vrot.slane %v618_v32, %v4456_v25 }
  0x39   : > { %3943 = vmatprep.mubr.bf16.mxu0 %v1254_v60  ;;  %v998_v7 = vrot.slane %v984_v4, %v4456_v25  ;;  %v1000_v8 = vcombine.low %v608_v28, %v616_v2  ;;  %v1001_v10 = vcombine.low %v615_v59, %v617_v3  ;;  %v649_v16 = vrot.slane %v4465_v29, %v4456_v25  ;;  %v399_v28 = vld [vmem:[%s4421_s18 + $0xb0] sm:$0xff] }
  0x3a   : > { %v1255_v11 = vpack.c.bf16 %v982_v5, %v965_v1  ;;  %v633_v14 = vcombine.high %v625_v23, %v625_v23  ;;  %v634_v15 = vcombine.high %v632_v31, %v632_v31  ;;  %v656_v24 = vrot.slane %v642_v33, %v4456_v25 }
  0x3b   : > { %v999_v17 = vcombine.low %v991_v6, %v998_v7  ;;  %v1008_v19 = vrot.slane %v1000_v8, %v4456_v25  ;;  %v1015_v20 = vrot.slane %v1001_v10, %v4456_v25  ;;  %v657_v32 = vcombine.high %v649_v16, %v649_v16  ;;  %v4175_v7 = vld.sshfl [vmem:[%s4421_s18 + $0xb8] sm:$0x3 pattern:$0x76325410] }
  0x3c   : > { %v1017_v35 = vcombine.low %v625_v23, %v633_v14  ;;  %v1018_v36 = vcombine.low %v632_v31, %v634_v15  ;;  %v1034_v37 = vcombine.low %v4172_v0, %v649_v16  ;;  %v658_v41 = vcombine.high %v656_v24, %v656_v24  ;;  %3944 = vmatmul.mubr.bf16.gmra.mrb[4].mxu0 %v1255_v11 }
  0x3d   : > { %v1016_v39 = vcombine.low %v1008_v19, %v1015_v20  ;;  %v666_v12 = vrot.slane %v4468_v30, %v4456_v25  ;;  %v673_v21 = vrot.slane %v659_v34, %v4456_v25  ;;  %v1035_v42 = vcombine.low %v657_v32, %v656_v24  ;;  %v401_v24 = vld [vmem:[%s4421_s18 + $0xc0] sm:$0xff] }
  0x3e   : > { %v1025_v29 = vrot.slane %v1017_v35, %v4456_v25  ;;  %v1032_v33 = vrot.slane %v1018_v36, %v4456_v25  ;;  %v1042_v43 = vrot.slane %v1034_v37, %v4456_v25  ;;  %v690_v30 = vrot.slane %v395_v40, %v4456_v25  ;;  %v402_v37 = vld [vmem:[%s4421_s18 + $0xc8] sm:$0xff] }
  0x3f   : > { %v1256_v13 = vpack.c.bf16 %v1016_v39, %v999_v17  ;;  %v674_v26 = vcombine.high %v666_v12, %v666_v12  ;;  %v675_v45 = vcombine.high %v673_v21, %v673_v21  ;;  %v1049_v47 = vrot.slane %v1035_v42, %v4456_v25  ;;  %v4176_v42 = vld.sshfl [vmem:[%s4421_s18 + $0xd0] sm:$0x3 pattern:$0x76325410] }
  0x40   : > { %v1033_v46 = vcombine.low %v1025_v29, %v1032_v33  ;;  %v1051_v34 = vcombine.low %v658_v41, %v666_v12  ;;  %v683_v51 = vcombine.high %v395_v40, %v395_v40  ;;  %v700_v52 = vcombine.high %v396_v44, %v396_v44 }
  0x41   : > { %3947 = vmatprep.mubr.bf16.mxu0 %v1256_v13  ;;  %v1052_v48 = vcombine.low %v674_v26, %v673_v21  ;;  %v1068_v49 = vcombine.low %v675_v45, %v4173_v38  ;;  %v1050_v18 = vcombine.low %v1042_v43, %v1049_v47  ;;  %v698_v27 = vcombine.high %v690_v30, %v690_v30  ;;  %v404_v45 = vld [vmem:[%s4421_s18 + $0xd8] sm:$0xff] }
  0x42   : > { %v1059_v53 = vrot.slane %v1051_v34, %v4456_v25  ;;  %v707_v55 = vrot.slane %v396_v44, %v4456_v25  ;;  %v697_v58 = vrot.slane %v683_v51, %v4456_v25  ;;  %v714_v22 = vrot.slane %v700_v52, %v4456_v25  ;;  %v405_v51 = vld [vmem:[%s4421_s18 + $0xe0] sm:$0xff] }
  0x43   : > { %v1066_v56 = vrot.slane %v1052_v48, %v4456_v25  ;;  %v1076_v57 = vrot.slane %v1068_v49, %v4456_v25  ;;  %v1257_v59 = vpack.c.bf16 %v1050_v18, %v1033_v46  ;;  %v1069_v60 = vcombine.low %v690_v30, %v698_v27 }
  0x44   : > { %v715_v61 = vcombine.high %v707_v55, %v707_v55  ;;  %v699_v63 = vcombine.high %v697_v58, %v697_v58  ;;  %v716_v0 = vcombine.high %v714_v22, %v714_v22  ;;  %v731_v1 = vrot.slane %v398_v54, %v4456_v25 }
  0x45   : > { %v1067_v62 = vcombine.low %v1059_v53, %v1066_v56  ;;  %3948 = vmatmul.mubr.bf16.gmra.mrb[8].mxu0 %v1257_v59  ;;  %v1083_v2 = vrot.slane %v1069_v60, %v4456_v25  ;;  %v724_v4 = vcombine.high %v398_v54, %v398_v54  ;;  %v741_v5 = vcombine.high %v399_v28, %v399_v28 }
  0x46   : > { %v1086_v3 = vcombine.low %v707_v55, %v715_v61  ;;  %v1085_v6 = vcombine.low %v697_v58, %v699_v63  ;;  %v1102_v23 = vcombine.low %v714_v22, %v716_v0  ;;  %v1103_v31 = vcombine.low %v4174_v50, %v731_v1 }
  0x47   : > { %v739_v8 = vcombine.high %v731_v1, %v731_v1  ;;  %v1084_v10 = vcombine.low %v1076_v57, %v1083_v2  ;;  %v738_v14 = vrot.slane %v724_v4, %v4456_v25  ;;  %v748_v15 = vrot.slane %v399_v28, %v4456_v25 }
  0x48   : > { %v1100_v11 = vrot.slane %v1086_v3, %v4456_v25  ;;  %v1093_v16 = vrot.slane %v1085_v6, %v4456_v25  ;;  %v1110_v17 = vrot.slane %v1102_v23, %v4456_v25  ;;  %v1117_v19 = vrot.slane %v1103_v31, %v4456_v25  ;;  %v3760_v31 = vld.sshfl [vmem:[%s4421_s18 + $0xe8] sm:$0x3 pattern:$0x76325410] }
  0x49   : > { %v755_v20 = vrot.slane %v741_v5, %v4456_v25  ;;  %v1258_v32 = vpack.c.bf16 %v1084_v10, %v1067_v62  ;;  %v740_v35 = vcombine.high %v738_v14, %v738_v14  ;;  %v756_v36 = vcombine.high %v748_v15, %v748_v15 }
  0x4a   : > { %v1101_v38 = vcombine.low %v1093_v16, %v1100_v11  ;;  %v1118_v39 = vcombine.low %v1110_v17, %v1117_v19  ;;  %v1119_v41 = vcombine.low %v739_v8, %v738_v14  ;;  %v765_v29 = vcombine.high %v401_v24, %v401_v24 }
  0x4b   : > { %v757_v40 = vcombine.high %v755_v20, %v755_v20  ;;  %3951 = vmatprep.mubr.bf16.mxu0 %v1258_v32  ;;  %v1120_v12 = vcombine.low %v740_v35, %v748_v15  ;;  %v1136_v21 = vcombine.low %v756_v36, %v755_v20  ;;  %v772_v33 = vrot.slane %v401_v24, %v4456_v25 }
  0x4c   : > { %v1259_v43 = vpack.c.bf16 %v1118_v39, %v1101_v38  ;;  %v1127_v44 = vrot.slane %v1119_v41, %v4456_v25  ;;  %v782_v26 = vcombine.high %v402_v37, %v402_v37  ;;  %v779_v30 = vrot.slane %v765_v29, %v4456_v25 }
  0x4d   : > { %v1137_v13 = vcombine.low %v757_v40, %v4175_v7  ;;  %v1134_v46 = vrot.slane %v1120_v12, %v4456_v25  ;;  %v1144_v47 = vrot.slane %v1136_v21, %v4456_v25  ;;  %v780_v34 = vcombine.high %v772_v33, %v772_v33  ;;  %v4625_v40 = vld [vmem:[%s5812_s4] ss:$0 sm:$0xff] }
  0x4e   : > { %3952 = vmatmul.mubr.bf16.gmra.mrb[12].mxu0 %v1259_v43  ;;  %v789_v49 = vrot.slane %v402_v37, %v4456_v25  ;;  %v796_v50 = vrot.slane %v782_v26, %v4456_v25  ;;  %v781_v18 = vcombine.high %v779_v30, %v779_v30  ;;  %v806_v53 = vcombine.high %v404_v45, %v404_v45  ;;  %v4630_v12 = vld [vmem:[%s5813_s5] ss:$0 sm:$0xff] }
  0x4f   : > { %v1151_v48 = vrot.slane %v1137_v13, %v4456_v25  ;;  %v1135_v52 = vcombine.low %v1127_v44, %v1134_v46  ;;  %v1153_v27 = vcombine.low %v772_v33, %v780_v34  ;;  %v813_v57 = vrot.slane %v404_v45, %v4456_v25 }
  0x50   : > { %v797_v55 = vcombine.high %v789_v49, %v789_v49  ;;  %v798_v56 = vcombine.high %v796_v50, %v796_v50  ;;  %v1154_v58 = vcombine.low %v779_v30, %v781_v18  ;;  %v820_v28 = vrot.slane %v806_v53, %v4456_v25 }
  0x51   : > { %v1152_v54 = vcombine.low %v1144_v47, %v1151_v48  ;;  %v1161_v22 = vrot.slane %v1153_v27, %v4456_v25  ;;  %v823_v59 = vcombine.high %v405_v51, %v405_v51  ;;  %v821_v63 = vcombine.high %v813_v57, %v813_v57 }
  0x52   : > { %v1170_v61 = vcombine.low %v789_v49, %v797_v55  ;;  %v1171_v62 = vcombine.low %v796_v50, %v798_v56  ;;  %v1168_v0 = vrot.slane %v1154_v58, %v4456_v25  ;;  %v822_v1 = vcombine.high %v820_v28, %v820_v28 }
  0x53   : > { %v1260_v60 = vpack.c.bf16 %v1152_v54, %v1135_v52  ;;  %v830_v2 = vrot.slane %v405_v51, %v4456_v25  ;;  %v837_v3 = vrot.slane %v823_v59, %v4456_v25  ;;  %v1187_v6 = vcombine.low %v4176_v42, %v813_v57 }
  0x54   : > { %v1178_v4 = vrot.slane %v1170_v61, %v4456_v25  ;;  %v1185_v5 = vrot.slane %v1171_v62, %v4456_v25  ;;  %v1188_v23 = vcombine.low %v821_v63, %v820_v28  ;;  %v1169_v7 = vcombine.low %v1161_v22, %v1168_v0 }
  0x55   : > { %3955 = vmatprep.mubr.bf16.mxu0 %v1260_v60  ;;  %v838_v8 = vcombine.high %v830_v2, %v830_v2  ;;  %v1204_v10 = vcombine.low %v822_v1, %v830_v2  ;;  %v839_v11 = vcombine.high %v837_v3, %v837_v3  ;;  %v1195_v15 = vrot.slane %v1187_v6, %v4456_v25 }
  0x56   : > { %v1186_v14 = vcombine.low %v1178_v4, %v1185_v5  ;;  %v1202_v16 = vrot.slane %v1188_v23, %v4456_v25  ;;  %v4641_v48 = vstv %s3757_s25  ;;  %v4651_v55 = vadd.s32 16, %v4428_v9 }
  0x57   : > { %v1205_v17 = vcombine.low %v838_v8, %v837_v3  ;;  %v1212_v19 = vrot.slane %v1204_v10, %v4456_v25  ;;  %v1221_v20 = vcombine.low %v839_v11, %v3760_v31  ;;  %v4647_v52 = vadd.s32 2, %v4641_v48 }
  0x58   : > { %v1261_v24 = vpack.c.bf16 %v1186_v14, %v1169_v7  ;;  %v1203_v32 = vcombine.low %v1195_v15, %v1202_v16  ;;  %v4657_v28 = vadd.s32 3, %v4641_v48  ;;  %v4668_v11 = vadd.s32 1, %v4641_v48 }
  0x59   : > { %v1219_v35 = vrot.slane %v1205_v17, %v4456_v25  ;;  %v1228_v36 = vrot.slane %v1221_v20, %v4456_v25  ;;  %v4675_v16 = vadd.s32 4, %v4641_v48  ;;  %v4678_v17 = vadd.s32 5, %v4641_v48 }
  0x5a   : > { %3956 = vmatmul.mubr.bf16.gmra.mrb[16].mxu0 %v1261_v24  ;;  %vm1961_vm0 = vcmp.ge.s32.totalorder %v4657_v28, 1  ;;  %vm1971_vm1 = vcmp.le.s32.totalorder %v4657_v28, 16  ;;  %vm1960_vm2 = vcmp.ge.s32.totalorder %v4647_v52, 1  ;;  %vm1970_vm3 = vcmp.le.s32.totalorder %v4647_v52, 16 }
  0x5b   : > { %v1220_v37 = vcombine.low %v1212_v19, %v1219_v35  ;;  %v1263_v39 = vpack.c.bf16 %v1228_v36, %v1228_v36  ;;  %vm1959_vm5 = vcmp.ge.s32.totalorder %v4668_v11, 1  ;;  %vm1969_vm6 = vcmp.le.s32.totalorder %v4668_v11, 16  ;;  %vm4770_vm9 = vmand %vm1961_vm0, %vm1971_vm1 }
  0x5c   : > { %vm1958_vm7 = vcmp.ge.s32.totalorder %v4641_v48, 1  ;;  %vm1968_vm8 = vcmp.le.s32.totalorder %v4641_v48, 16  ;;  %vm4786_vm10 = vmand %vm1960_vm2, %vm1970_vm3  ;;  %vm2023_vm11 = vcmp.le.s32.totalorder %v4651_v55, 16  ;;  %vm1962_vm15 = vcmp.ge.s32.totalorder %v4675_v16, 1 }
  0x5d   : > { %v1262_v38 = vpack.c.bf16 %v1220_v37, %v1203_v32  ;;  %vm4810_vm12 = vmand %vm4786_vm10, %vm1988_vm4  ;;  %vm1972_vm0 = vcmp.le.s32.totalorder %v4675_v16, 16  ;;  %vm2673_vm3 = vcmask 1046528  }
  0x5e   : > { %vm4821_vm13 = vmand %vm4770_vm9, %vm1988_vm4 }
  0x5f   : > { %3959 = vmatprep.mubr.bf16.mxu0 %v1262_v38  ;;  %vm4835_vm14 = vmand %vm1959_vm5, %vm1969_vm6 }
  0x60   : > { %vm4865_vm1 = vmand %vm4835_vm14, %vm1988_vm4 }
  0x61   : > { %vm4888_vm2 = vmand %vm1958_vm7, %vm1968_vm8  ;;  %vm1963_vm7 = vcmp.ge.s32.totalorder %v4678_v17, 1  ;;  %vm1973_vm8 = vcmp.le.s32.totalorder %v4678_v17, 16 }
  0x62   : > { %3960 = vmatmul.mubr.bf16.gmra.mrb[20].mxu0 %v1263_v39  ;;  %v4689_v39 = vadd.s32 6, %v4641_v48  ;;  %vm4913_vm5 = vmand %vm4888_vm2, %vm2023_vm11 }
  0x63   : > { %vm4923_vm6 = vmand %vm4888_vm2, %vm1988_vm4 }
 0x107   : > { %v3941_v41 = vpop.f32.mrb[0].mxu0 }
 0x108   : > { %v1465_v21 = vmul.f32 %v3941_v41, %v4625_v40  ;;  %v1362_v29 = vpop.f32.mrb[1].mxu0 }
 0x109   : > { %v1463_v33 = vmul.f32 %v4625_v40, %v1362_v29  ;;  %v3942_v42 = vpop.f32.mrb[2].mxu0 }
 0x10a   : > { %v1495_v43 = vadd.f32 %v4630_v12, %v1465_v21  ;;  %v1466_v44 = vmul.f32 %v3942_v42, %v4625_v40  ;;  %v1365_v13 = vpop.f32.mrb[3].mxu0 }
 0x10b   : > { %v1493_v26 = vadd.f32 %v4630_v12, %v1463_v33  ;;  %v1464_v45 = vmul.f32 %v4625_v40, %v1365_v13 }
 0x10c   : > { %v1518_v46 = vmax.f32 %v1495_v43, 0.0  ;;  %v1496_v47 = vadd.f32 %v4630_v12, %v1466_v44 }
 0x10d   : > { %v1516_v30 = vmax.f32 %v1493_v26, 0.0  ;;  %v1494_v34 = vadd.f32 %v4630_v12, %v1464_v45 }
 0x10e   : > { %v1596_v49 = vcombine.high %v1518_v46, %v1518_v46  ;;  %v4644_v50 = vrot.slane %v1518_v46, %v4456_v25  ;;  %v1519_v51 = vmax.f32 %v1496_v47, 0.0 }
 0x10f   : > { %v1562_v18 = vcombine.high %v1516_v30, %v1516_v30  ;;  %v1569_v27 = vrot.slane %v1516_v30, %v4456_v25  ;;  %v1517_v53 = vmax.f32 %v1494_v34, 0.0  ;;  %v3945_v54 = vpop.f32.mrb[4].mxu0 }
 0x110   : > { %v1610_v56 = vrot.slane %v1596_v49, %v4456_v25  ;;  %v1611_v57 = vcombine.high %v4644_v50, %v4644_v50  ;;  %v1613_v58 = vcombine.high %v1519_v51, %v1519_v51  ;;  %v1378_v22 = vpop.f32.mrb[5].mxu0  ;;  %v1620_v61 = vrot.slane %v1519_v51, %v4456_v25 }
 0x111   : > { %v1576_v59 = vrot.slane %v1562_v18, %v4456_v25  ;;  %v1577_v60 = vcombine.high %v1569_v27, %v1569_v27  ;;  %v1579_v62 = vcombine.high %v1517_v53, %v1517_v53  ;;  %v3946_v63 = vpop.f32.mrb[6].mxu0  ;;  %v1586_v3 = vrot.slane %v1517_v53, %v4456_v25 }
 0x112   : > { %v2095_v0 = vcombine.low %v1611_v57, %v1610_v56  ;;  %v1612_v1 = vcombine.high %v1610_v56, %v1610_v56  ;;  %v1627_v2 = vrot.slane %v1613_v58, %v4456_v25  ;;  %v1381_v4 = vpop.f32.mrb[7].mxu0  ;;  %v1628_v23 = vcombine.high %v1620_v61, %v1620_v61 }
 0x113   : > { %v1578_v5 = vcombine.high %v1576_v59, %v1576_v59  ;;  %v4663_v6 = vcombine.low %v1569_v27, %v1577_v60  ;;  %v1593_v31 = vrot.slane %v1579_v62, %v4456_v25  ;;  %v1594_v8 = vcombine.high %v1586_v3, %v1586_v3 }
 0x114   : > { %v2096_v7 = vcombine.low %v1612_v1, %v1620_v61  ;;  %v1469_v10 = vmul.f32 %v3945_v54, %v4625_v40  ;;  %v4672_v15 = vcombine.low %v1628_v23, %v1627_v2  ;;  %v2103_v19 = vrot.slane %v2095_v0, %v4456_v25 }
 0x115   : > { %v4670_v14 = vcombine.low %v1576_v59, %v1578_v5  ;;  %v1467_v32 = vmul.f32 %v4625_v40, %v1378_v22  ;;  %v2094_v35 = vrot.slane %v4644_v50, %v4456_v25  ;;  %v2062_v36 = vrot.slane %v4663_v6, %v4456_v25 }
 0x116   : > { %v2110_v20 = vrot.slane %v2096_v7, %v4456_v25  ;;  %v1499_v24 = vadd.f32 %v4630_v12, %v1469_v10  ;;  %v1595_v37 = vcombine.high %v1593_v31, %v1593_v31  ;;  %v4693_v21 = vcombine.low %v1586_v3, %v1594_v8 }
 0x117   : > { %v1497_v33 = vadd.f32 %v4630_v12, %v1467_v32  ;;  %v2069_v43 = vrot.slane %v4670_v14, %v4456_v25  ;;  %v2120_v44 = vrot.slane %v4672_v15, %v4456_v25  ;;  %v1470_v13 = vmul.f32 %v3946_v63, %v4625_v40 }
 0x118   : > { %v3949_v38 = vpop.f32.mrb[8].mxu0  ;;  %v4691_v41 = vcombine.low %v2103_v19, %v2110_v20  ;;  %v1522_v29 = vmax.f32 %v1499_v24, 0.0  ;;  %v1468_v26 = vmul.f32 %v4625_v40, %v1381_v4  ;;  %v4708_v51 = vcombine.low %v1593_v31, %v1595_v37 }
 0x119   : > { %v1394_v42 = vpop.f32.mrb[9].mxu0  ;;  %v1520_v30 = vmax.f32 %v1497_v33, 0.0  ;;  %v1473_v34 = vmul.f32 %v3949_v38, %v4625_v40  ;;  %v1500_v18 = vadd.f32 %v4630_v12, %v1470_v13  ;;  %v2079_v22 = vrot.slane %v4693_v21, %v4456_v25 }
 0x11a   : > { %v4702_v45 = vpop.f32.mrb[10].mxu0  ;;  %v1664_v46 = vcombine.high %v1522_v29, %v1522_v29  ;;  %v1671_v47 = vrot.slane %v1522_v29, %v4456_v25  ;;  %v1498_v27 = vadd.f32 %v4630_v12, %v1468_v26  ;;  %v1471_v53 = vmul.f32 %v4625_v40, %v1394_v42 }
 0x11b   : > { %v4706_v49 = vpop.f32.mrb[11].mxu0  ;;  %v1630_v57 = vcombine.high %v1520_v30, %v1520_v30  ;;  %v4717_v58 = vrot.slane %v1520_v30, %v4456_v25  ;;  %v1629_v59 = vcombine.high %v1627_v2, %v1627_v2  ;;  %v1523_v60 = vmax.f32 %v1500_v18, 0.0 }
 0x11c   : > { %v4714_v54 = vrot.slane %v1664_v46, %v4456_v25  ;;  %v1679_v56 = vcombine.high %v1671_v47, %v1671_v47  ;;  %v1521_v61 = vmax.f32 %v1498_v27, 0.0  ;;  %v1503_v0 = vadd.f32 %v4630_v12, %v1473_v34 }
 0x11d   : > { %v1644_v63 = vrot.slane %v1630_v57, %v4456_v25  ;;  %v1501_v1 = vadd.f32 %v4630_v12, %v1471_v53  ;;  %v2113_v3 = vcombine.low %v1629_v59, %v4717_v58  ;;  %v1681_v2 = vcombine.high %v1523_v60, %v1523_v60 }
 0x11e   : > { %v4725_v62 = vcombine.low %v1671_v47, %v1679_v56  ;;  %v1680_v4 = vcombine.high %v4714_v54, %v4714_v54  ;;  %v1688_v5 = vrot.slane %v1523_v60, %v4456_v25  ;;  %v2086_v23 = vrot.slane %v4708_v51, %v4456_v25 }
 0x11f   : > { %v1646_v7 = vcombine.high %v1644_v63, %v1644_v63  ;;  %v1647_v8 = vcombine.high %v1521_v61, %v1521_v61  ;;  %v2127_v15 = vrot.slane %v2113_v3, %v4456_v25  ;;  %v1695_v19 = vrot.slane %v1681_v2, %v4456_v25 }
 0x120   : > { %v2168_v31 = vrot.slane %v4725_v62, %v4456_v25  ;;  %v1696_v20 = vcombine.high %v1688_v5, %v1688_v5  ;;  %v2177_v24 = vcombine.low %v1680_v4, %v1688_v5  ;;  %v1654_v38 = vrot.slane %v1521_v61, %v4456_v25  ;;  %v4126_v5 = vld [vmem:[%s5810_s2] sm:$0xff]  }
 0x121   : > { %v4739_v10 = vpop.f32.mrb[12].mxu0  ;;  %v2136_v37 = vcombine.low %v1644_v63, %v1646_v7  ;;  %v1661_v29 = vrot.slane %v1647_v8, %v4456_v25  ;;  %v1526_v33 = vmax.f32 %v1503_v0, 0.0  ;;  %v4751_v13 = vcombine.low %v2120_v44, %v2127_v15  ;;  %v4125_v44 = vld [vmem:[%s5810_s2 + $0x40] sm:$0xff]  }
 0x122   : > { %v4745_v32 = vpop.f32.mrb[13].mxu0  ;;  %v2178_v26 = vcombine.low %v1696_v20, %v1695_v19  ;;  %v2185_v46 = vrot.slane %v2177_v24, %v4456_v25  ;;  %v1524_v47 = vmax.f32 %v1501_v1, 0.0  ;;  %v1662_v51 = vcombine.high %v1654_v38, %v1654_v38  ;;  %3839 = vmatprep.subr.bf16.mxu0 %v4125_v44  ;;  %4003 = vmatprep.subr.bf16.mxu1 %v4125_v44 }
 0x123   : > { %v4749_v42 = vpop.f32.mrb[14].mxu0  ;;  %v2144_v34 = vrot.slane %v2136_v37, %v4456_v25  ;;  %v1663_v18 = vcombine.high %v1661_v29, %v1661_v29  ;;  %v1732_v27 = vcombine.high %v1526_v33, %v1526_v33  ;;  %v1739_v56 = vrot.slane %v1526_v33, %v4456_v25  ;;  %3840 = vmatpush3.bf16.msra.mxu0 %v4126_v5 }
 0x124   : > { %v4754_v30 = vpop.f32.mrb[15].mxu0  ;;  %v2192_v53 = vrot.slane %v2178_v26, %v4456_v25  ;;  %v1697_v57 = vcombine.high %v1695_v19, %v1695_v19  ;;  %v1698_v59 = vcombine.high %v1524_v47, %v1524_v47  ;;  %v2137_v60 = vcombine.low %v1654_v38, %v1662_v51  ;;  %4011 = vmatpush3.bf16.msra.mxu1 %v4126_v5 }
 0x125   : > { %v2153_v61 = vcombine.low %v1661_v29, %v1663_v18  ;;  %v1746_v62 = vrot.slane %v1732_v27, %v4456_v25  ;;  %v1705_v63 = vrot.slane %v1524_v47, %v4456_v25  ;;  %v1747_v3 = vcombine.high %v1739_v56, %v1739_v56 }
 0x126   : > { %v2193_v1 = vcombine.low %v2185_v46, %v2192_v53  ;;  %v4775_v4 = vrot.slane %v1698_v59, %v4456_v25  ;;  %v1474_v2 = vmul.f32 %v4702_v45, %v4625_v40  ;;  %v2151_v7 = vrot.slane %v2137_v60, %v4456_v25 }
 0x127   : > { %v2161_v8 = vrot.slane %v2153_v61, %v4456_v25  ;;  %v1748_v15 = vcombine.high %v1746_v62, %v1746_v62  ;;  %v1713_v19 = vcombine.high %v1705_v63, %v1705_v63  ;;  %v4799_v52 = vcombine.low %v2062_v36, %v2069_v43 }
 0x128   : > { %v4804_v45 = vcombine.low %v2079_v22, %v2086_v23  ;;  %v2194_v24 = vcombine.low %v1697_v57, %v1705_v63  ;;  %v4815_v14 = vadd.s32 7, %v4641_v48  ;;  %v2152_v36 = vcombine.low %v2144_v34, %v2151_v7  ;;  %v4127_v7 = vld [vmem:[%s5810_s2 + $0x48] sm:$0xff]  }
 0x129   : > { %v2169_v21 = vcombine.low %v2161_v8, %v2168_v31  ;;  %v2235_v43 = vcombine.low %v1739_v56, %v1747_v3  ;;  %v2195_v22 = vcombine.low %v1713_v19, %v4775_v4  ;;  %v1645_v23 = vcombine.high %v4717_v58, %v4717_v58  ;;  %3841 = vmatprep.subr.bf16.mxu0 %v4127_v7 }
 0x12a   : > { %v2236_v37 = vcombine.low %v1746_v62, %v1748_v15  ;;  %v1504_v38 = vadd.f32 %v4630_v12, %v1474_v2  ;;  %v1472_v29 = vmul.f32 %v4625_v40, %v4706_v49  ;;  %v2500_v31 = vsel %vm4810_vm12, %v2152_v36, 0.0  ;;  %4004 = vmatprep.subr.bf16.mxu1 %v4127_v7  ;;  %vm4964_vm12 = vmand %vm1962_vm15, %vm1972_vm0 }
 0x12b   : > { %v2501_v58 = vsel %vm4786_vm10, %v2169_v21, 0.0  ;;  %v2202_v26 = vrot.slane %v2194_v24, %v4456_v25  ;;  %v2209_v46 = vrot.slane %v2195_v22, %v4456_v25  ;;  %v1477_v51 = vmul.f32 %v4739_v10, %v4625_v40  ;;  %vm5001_vm0 = vmand %vm4964_vm12, %vm1988_vm4 }
 0x12c   : > { %v4847_v49 = vpack.c.bf16 %v2501_v58, %v2500_v31  ;;  %v1527_v34 = vmax.f32 %v1504_v38, 0.0  ;;  %v1502_v11 = vadd.f32 %v4630_v12, %v1472_v29  ;;  %v2503_v27 = vsel %vm4821_vm13, %v2193_v1, 0.0  ;;  %vm4987_vm13 = vmand %vm4835_vm14, %vm2023_vm11 }
 0x12d   : > { %v4845_v47 = vpop.f32.mrb[16].mxu0  ;;  %v2243_v53 = vrot.slane %v2235_v43, %v4456_v25  ;;  %v2210_v56 = vcombine.low %v2202_v26, %v2209_v46  ;;  %v1475_v57 = vmul.f32 %v4625_v40, %v4745_v32  ;;  %v1507_v62 = vadd.f32 %v4630_v12, %v1477_v51 }
 0x12e   : > { %v4852_v18 = vpop.f32.mrb[17].mxu0  ;;  %v1749_v44 = vcombine.high %v1527_v34, %v1527_v34  ;;  %v4872_v60 = vrot.slane %v1527_v34, %v4456_v25  ;;  %v1525_v61 = vmax.f32 %v1502_v11, 0.0  ;;  %v2250_v32 = vrot.slane %v2236_v37, %v4456_v25 }
 0x12f   : > { %v4869_v59 = vpop.f32.mrb[18].mxu0  ;;  %v2504_v1 = vsel %vm4770_vm9, %v2210_v56, 0.0  ;;  %v1505_v3 = vadd.f32 %v4630_v12, %v1475_v57  ;;  %v2498_v2 = vsel %vm4835_vm14, %v4751_v13, 0.0  ;;  %v2497_v13 = vsel %vm4865_vm1, %v4691_v41, 0.0 }
 0x130   : > { %v4875_v63 = vpop.f32.mrb[19].mxu0  ;;  %v4895_v8 = vpack.c.bf16 %v2504_v1, %v2503_v27  ;;  %v1763_v15 = vrot.slane %v1749_v44, %v4456_v25  ;;  %v1764_v19 = vcombine.high %v4872_v60, %v4872_v60  ;;  %v1715_v20 = vcombine.high %v1525_v61, %v1525_v61 }
 0x131   : > { %v1722_v24 = vrot.slane %v1525_v61, %v4456_v25  ;;  %v1530_v6 = vmax.f32 %v1507_v62, 0.0  ;;  %v1528_v36 = vmax.f32 %v1505_v3, 0.0  ;;  %v4905_v21 = vrot.slane %v1645_v23, %v4456_v25  ;;  %v4128_v61 = vld [vmem:[%s5810_s2 + $0x8] sm:$0xff]  }
 0x132   : > { %v2259_v43 = vcombine.low %v1764_v19, %v1763_v15  ;;  %v1765_v22 = vcombine.high %v1763_v15, %v1763_v15  ;;  %v4907_v37 = vpack.c.bf16 %v2498_v2, %v2497_v13  ;;  %v1729_v38 = vrot.slane %v1715_v20, %v4456_v25  ;;  %3842 = vmatpush3.bf16.msra.mxu0 %v4128_v61 }
 0x133   : > { %v1730_v29 = vcombine.high %v1722_v24, %v1722_v24  ;;  %v1800_v31 = vcombine.high %v1530_v6, %v1530_v6  ;;  %v1807_v58 = vrot.slane %v1530_v6, %v4456_v25  ;;  %v4929_v46 = vcombine.low %v2243_v53, %v2250_v32  ;;  %4012 = vmatpush3.bf16.msra.mxu1 %v4128_v61 }
 0x134   : > { %v1766_v34 = vcombine.high %v1528_v36, %v1528_v36  ;;  %v1773_v11 = vrot.slane %v1528_v36, %v4456_v25  ;;  %2715 = vrot.lane.b32.xlu1 %v4907_v37, %s4274_s22  ;;  %v2495_v51 = vsel %vm4888_vm2, %v4804_v45, 0.0  ;;  %v1731_v56 = vcombine.high %v1729_v38, %v1729_v38  ;;  %vm5038_vm2 = vmand %vm4786_vm10, %vm2023_vm11 }
 0x135   : > { %v4927_v26 = vpop.f32.mrb[20].mxu0  ;;  %v2218_v57 = vcombine.low %v1722_v24, %v1730_v29  ;;  %v1814_v10 = vrot.slane %v1800_v31, %v4456_v25  ;;  %v1815_v44 = vcombine.high %v1807_v58, %v1807_v58  ;;  %v2267_v62 = vrot.slane %v2259_v43, %v4456_v25  ;;  %vm5071_vm10 = vmand %vm1963_vm7, %vm1973_vm8 }
 0x136   : > { %v4937_v27 = vpop.f32.mrb[21].mxu0  ;;  %v2260_v32 = vcombine.low %v1765_v22, %v1773_v11  ;;  %v2494_v1 = vsel %vm4923_vm6, %v4799_v52, 0.0  ;;  %v2496_v45 = vsel %vm4913_vm5, %v2094_v35, 0.0  ;;  %v2219_v2 = vcombine.low %v1729_v38, %v1731_v56  ;;  %v4129_v52 = vld [vmem:[%s5810_s2 + $0x50] sm:$0xff]   ;;  %vm5098_vm5 = vmand %vm5071_vm10, %vm1988_vm4 }
 0x137   : > { %v3962_v53 = vpop.f32.mrb[22].mxu0  ;;  %v2226_v5 = vrot.slane %v2218_v57, %v4456_v25  ;;  %v1816_v7 = vcombine.high %v1814_v10, %v1814_v10  ;;  %v1781_v15 = vcombine.high %v1773_v11, %v1773_v11  ;;  %v4968_v35 = vcombine.low %v1807_v58, %v1815_v44  ;;  %3843 = vmatprep.subr.bf16.mxu0 %v4129_v52 }
 0x138   : > { %v4952_v3 = vpop.f32.mrb[23].mxu0  ;;  %v2274_v19 = vrot.slane %v2260_v32, %v4456_v25  ;;  %v4971_v13 = vpack.c.bf16 %v2495_v51, %v2494_v1  ;;  %v4973_v20 = vpack.c.bf16 %v2496_v45, %v2496_v45  ;;  %v2176_v24 = vrot.slane %v4714_v54, %v4456_v25  ;;  %v4130_v54 = vld [vmem:[%s5810_s2 + $0x10] sm:$0xff]   ;;  %4005 = vmatprep.subr.bf16.mxu1 %v4129_v52  ;;  %v4132_v53 = vld [vmem:[%s5810_s2 + $0x18] sm:$0xff]  }
 0x139   : > { %v2233_v6 = vrot.slane %v2219_v2, %v4456_v25  ;;  %v4979_v16 = vrot.slane %v1766_v34, %v4456_v25  ;;  %v1478_v36 = vmul.f32 %v4749_v42, %v4625_v40  ;;  %vm2544_vm15 = vsmask.f32 7424  ;;  %3844 = vmatpush3.bf16.msra.mxu0 %v4130_v54  ;;  %4013 = vmatpush3.bf16.msra.mxu1 %v4130_v54 }
 0x13a   : > { %v2507_v22 = vsel %vm4964_vm12, %v4929_v46, 0.0  ;;  %v5005_v33 = vcombine.low %v2267_v62, %v2274_v19  ;;  %v2674_v41 = vrot.slane %v4971_v13, 1  ;;  %v2675_v38 = vrot.slane %v4973_v20, 1 }
 0x13b   : > { %v2234_v29 = vcombine.low %v2226_v5, %v2233_v6  ;;  %v5010_v31 = vcombine.low %v1781_v15, %v4979_v16  ;;  %v1508_v58 = vadd.f32 %v4630_v12, %v1478_v36  ;;  %v1476_v23 = vmul.f32 %v4625_v40, %v4754_v30  ;;  %v4131_v30 = vld [vmem:[%s5810_s2 + $0x58] sm:$0xff]  }
 0x13c   : > { %v2315_v46 = vrot.slane %v4968_v35, %v4456_v25  ;;  %v5017_v34 = vcombine.low %v1814_v10, %v1816_v7  ;;  %v2676_v11 = vsel %vm2673_vm3, %v2674_v41, %v2675_v38  ;;  %vm1964_vm14 = vcmp.ge.s32.totalorder %v4689_v39, 1  ;;  %3845 = vmatprep.subr.bf16.mxu0 %v4131_v30  ;;  %4006 = vmatprep.subr.bf16.mxu1 %v4131_v30  ;;  %v4133_v7 = vld [vmem:[%s5810_s2 + $0x60] sm:$0xff]  }
 0x13d   : > { %vm1974_vm1 = vcmp.le.s32.totalorder %v4689_v39, 16  ;;  %v2499_v51 = vsel %vm4987_vm13, %v4905_v21, 0.0  ;;  %v2506_v56 = vsel %vm5001_vm0, %v2234_v29, 0.0  ;;  %2698 = vrot.lane.b32.xlu0 %v2676_v11, %s4275_s23  ;;  %v1531_v57 = vmax.f32 %v1508_v58, 0.0  ;;  %3846 = vmatpush3.bf16.msra.mxu0 %v4132_v53  ;;  %v4135_v11 = vld [vmem:[%s5810_s2 + $0x68] sm:$0xff]  }
 0x13e   : > { %v1506_v10 = vadd.f32 %v4630_v12, %v1476_v23  ;;  %v5032_v44 = vpack.c.bf16 %v2499_v51, %v2499_v51  ;;  %v5045_v61 = vpack.c.bf16 %v2507_v22, %v2506_v56  ;;  %v1782_v62 = vcombine.high %v4979_v16, %v4979_v16  ;;  %4014 = vmatpush3.bf16.msra.mxu1 %v4132_v53  ;;  %v4134_v22 = vld [vmem:[%s5810_s2 + $0x20] sm:$0xff]   ;;  %vm5119_vm6 = vmand %vm1964_vm14, %vm1974_vm1 }
 0x13f   : > { %v2677_v32 = vrot.slane %v4907_v37, 1  ;;  %v2548_v1 = vshll.u32 %v4971_v13, 16  ;;  %v1824_v28 = vrot.slane %v1531_v57, %v4456_v25  ;;  %v2546_v5 = vshrl.u32 %v4971_v13, 16  ;;  %3847 = vmatprep.subr.bf16.mxu0 %v4133_v7  ;;  %4007 = vmatprep.subr.bf16.mxu1 %v4133_v7  ;;  %vm5143_vm7 = vmand %vm5119_vm6, %vm1988_vm4 }
 0x140   : > { %v1529_v45 = vmax.f32 %v1506_v10, 0.0  ;;  %v2678_v2 = vrot.slane %v5032_v44, 1  ;;  %v1817_v15 = vcombine.high %v1531_v57, %v1531_v57  ;;  %v2553_v19 = vshll.u32 %v4973_v20, 16  ;;  %vm5232_vm14 = vmand %vm4770_vm9, %vm2023_vm11 }
 0x141   : > { %v2550_v52 = vrot.slane %v2548_v1, 1  ;;  %v2502_v6 = vsel %vm5038_vm2, %v2176_v24, 0.0  ;;  %v1832_v16 = vcombine.high %v1824_v28, %v1824_v28  ;;  %v2680_v54 = vrot.slane %v4847_v49, 1  ;;  %3848 = vmatpush3.bf16.msra.mxu0 %v4134_v22  ;;  %vm5243_vm1 = vmand %vm4964_vm12, %vm2023_vm11 }
 0x142   : > { %v1783_v36 = vcombine.high %v1529_v45, %v1529_v45  ;;  %v5061_v43 = vrot.slane %v1529_v45, %v4456_v25  ;;  %v2679_v24 = vsel %vm2673_vm3, %v2677_v32, %v2678_v2  ;;  %v2555_v41 = vrot.slane %v2553_v19, 1  ;;  %3849 = vmatprep.subr.bf16.mxu0 %v4135_v11  ;;  %4015 = vmatpush3.bf16.msra.mxu1 %v4134_v22 }
 0x143   : > { %v2551_v42 = vor.u32 %v2550_v52, %v2546_v5  ;;  %v5076_v38 = vpack.c.bf16 %v2502_v6, %v2502_v6  ;;  %v2325_v29 = vrot.slane %v5017_v34, %v4456_v25  ;;  %v2284_v58 = vrot.slane %v5010_v31, %v4456_v25  ;;  %2700 = vrot.lane.b32.xlu1 %v2679_v24, %s4275_s23 }
 0x144   : > { %v2318_v23 = vcombine.low %v1824_v28, %v1832_v16  ;;  %v1797_v17 = vrot.slane %v1783_v36, %v4456_v25  ;;  %v5088_v51 = vrot.slane %v1817_v15, %v4456_v25  ;;  %v2277_v30 = vcombine.low %v1782_v62, %v5061_v43  ;;  %2747 = vrot.lane.b32.xlu0 %v2679_v24, %s4276_s19  ;;  %v4136_v62 = vld [vmem:[%s5810_s2 + $0x28] sm:$0xff]  }
 0x145   : > { %v2556_v34 = vsel %vm2544_vm15, %v2551_v42, %v2555_v41  ;;  %v2681_v31 = vrot.slane %v5076_v38, 1  ;;  %v2558_v21 = vshrl.u32 %v4907_v37, 16  ;;  %v2560_v53 = vshll.u32 %v4907_v37, 16  ;;  %4008 = vmatprep.subr.bf16.mxu1 %v4135_v11  ;;  %3850 = vmatpush3.bf16.msra.mxu0 %v4136_v62 }
 0x146   : > { %v2332_v57 = vrot.slane %v2318_v23, %v4456_v25  ;;  %v1799_v10 = vcombine.high %v1797_v17, %v1797_v17  ;;  %v2291_v32 = vrot.slane %v2277_v30, %v4456_v25  ;;  %v2565_v28 = vshll.u32 %v5032_v44, 16  ;;  %4016 = vmatpush3.bf16.msra.mxu1 %v4136_v62 }
 0x147   : > { %v5110_v1 = vsel %vm2673_vm3, %v2680_v54, %v2681_v31  ;;  %v1481_v45 = vmul.f32 %v4845_v47, %v4625_v40  ;;  %2717 = vrot.lane.b32.xlu1 %v4847_v49, %s4274_s22  ;;  %v2562_v15 = vrot.slane %v2560_v53, 1  ;;  %v1479_v44 = vmul.f32 %v4625_v40, %v4852_v18  ;;  %v4137_v47 = vld [vmem:[%s5810_s2 + $0x70] sm:$0xff]  }
 0x148   : > { %v2333_v5 = vcombine.low %v2325_v29, %v2332_v57  ;;  %v2300_v7 = vcombine.low %v1797_v17, %v1799_v10  ;;  %v2509_v39 = vsel %vm5098_vm5, %v5005_v33, 0.0  ;;  %v2292_v52 = vcombine.low %v2284_v58, %v2291_v32  ;;  %2641 = vrot.lane.b32.xlu0 %v2556_v34, %s4276_s19  ;;  %3851 = vmatprep.subr.bf16.mxu0 %v4137_v47  ;;  %v4139_v33 = vld [vmem:[%s5810_s2 + $0x78] sm:$0xff]   ;;  %vm2041_vm5 = vmand %vm5071_vm10, %vm2023_vm11 }
 0x149   : > { %v1511_v19 = vadd.f32 %v4630_v12, %v1481_v45  ;;  %v1833_v6 = vcombine.high %v5088_v51, %v5088_v51  ;;  %v2563_v18 = vor.u32 %v2562_v15, %v2558_v21  ;;  %v2567_v36 = vrot.slane %v2565_v28, 1  ;;  %4009 = vmatprep.subr.bf16.mxu1 %v4137_v47  ;;  %v4138_v21 = vld [vmem:[%s5810_s2 + $0x30] sm:$0xff]  }
 0x14a   : > { %v2308_v16 = vrot.slane %v2300_v7, %v4456_v25  ;;  %v1509_v54 = vadd.f32 %v4630_v12, %v1479_v44  ;;  %v2510_v22 = vsel %vm5071_vm10, %v2292_v52, 0.0  ;;  %v1482_v42 = vmul.f32 %v4869_v59, %v4625_v40  ;;  %3852 = vmatpush3.bf16.msra.mxu0 %v4138_v21  ;;  %4017 = vmatpush3.bf16.msra.mxu1 %v4138_v21 }
 0x14b   : > { %v1534_v24 = vmax.f32 %v1511_v19, 0.0  ;;  %v1480_v41 = vmul.f32 %v4625_v40, %v4875_v63  ;;  %v2513_v29 = vsel %vm5119_vm6, %v2333_v5, 0.0  ;;  %v5158_v23 = vpack.c.bf16 %v2510_v22, %v2509_v39  ;;  %2702 = vrot.lane.b32.xlu1 %v5110_v1, %s4275_s23  ;;  %v4140_v22 = vld [vmem:[%s5810_s2 + $0x38] sm:$0xff]   ;;  %3853 = vmatprep.subr.bf16.mxu0 %v4139_v33 }
 0x14c   : > { %v2316_v58 = vcombine.low %v2308_v16, %v2315_v46  ;;  %v1532_v17 = vmax.f32 %v1509_v54, 0.0  ;;  %2764 = vrot.lane.b32.xlu0 %v4847_v49, %s4275_s23  ;;  %v1512_v11 = vadd.f32 %v4630_v12, %v1482_v42  ;;  %vm1965_vm8 = vcmp.ge.s32.totalorder %v4815_v14, 1  ;;  %4010 = vmatprep.subr.bf16.mxu1 %v4139_v33 }
 0x14d   : > { %v1868_v59 = vcombine.high %v1534_v24, %v1534_v24  ;;  %v1875_v63 = vrot.slane %v1534_v24, %v4456_v25  ;;  %v1510_v30 = vadd.f32 %v4630_v12, %v1480_v41  ;;  %v5174_v56 = vsel %vm2544_vm15, %v2563_v18, %v2567_v36 }
 0x14e   : > { %v2512_v35 = vsel %vm5143_vm7, %v2316_v58, 0.0  ;;  %v1834_v46 = vcombine.high %v1532_v17, %v1532_v17  ;;  %v1841_v34 = vrot.slane %v1532_v17, %v4456_v25  ;;  %v1535_v10 = vmax.f32 %v1512_v11, 0.0  ;;  %3854 = vmatpush3.bf16.msra.mxu0 %v4140_v22  ;;  %4018 = vmatpush3.bf16.msra.mxu1 %v4140_v22  ;;  %vm2044_vm7 = vmand %vm5119_vm6, %vm2023_vm11 }
 0x14f   : > { %v5171_v31 = vpack.c.bf16 %v2513_v29, %v2512_v35  ;;  %v1882_v57 = vrot.slane %v1868_v59, %v4456_v25  ;;  %2766 = vrot.lane.b32.xlu1 %v4895_v8, %s4275_s23  ;;  %v1533_v28 = vmax.f32 %v1510_v30, 0.0  ;;  %v1883_v45 = vcombine.high %v1875_v63, %v1875_v63 }
 0x150   : > { %v1848_v53 = vrot.slane %v1834_v46, %v4456_v25  ;;  %v1849_v62 = vcombine.high %v1841_v34, %v1841_v34  ;;  %v2341_v32 = vcombine.low %v1833_v6, %v1841_v34  ;;  %2643 = vrot.lane.b32.xlu0 %v5174_v56, %s4276_s19  ;;  %v1885_v7 = vcombine.high %v1535_v10, %v1535_v10 }
 0x151   : > { %v1884_v5 = vcombine.high %v1882_v57, %v1882_v57  ;;  %v1892_v15 = vrot.slane %v1535_v10, %v4456_v25  ;;  %v1851_v52 = vcombine.high %v1533_v28, %v1533_v28  ;;  %v1798_v19 = vcombine.high %v5061_v43, %v5061_v43 }
 0x152   : > { %v2342_v44 = vcombine.low %v1849_v62, %v1848_v53  ;;  %v2349_v47 = vrot.slane %v2341_v32, %v4456_v25  ;;  %v1850_v39 = vcombine.high %v1848_v53, %v1848_v53  ;;  %vm1975_vm13 = vcmp.le.s32.totalorder %v4815_v14, 16 }
 0x153   : > { %v1899_v6 = vrot.slane %v1885_v7, %v4456_v25  ;;  %v5192_v16 = vadd.s32 8, %v4641_v48  ;;  %2719 = vrot.lane.b32.xlu1 %v4895_v8, %s4274_s22  ;;  %v1858_v36 = vrot.slane %v1533_v28, %v4456_v25  ;;  %v5199_v54 = vrot.slane %v1851_v52, %v4456_v25  ;;  %vm5221_vm0 = vmand %vm1965_vm8, %vm1975_vm13 }
 0x154   : > { %v2356_v18 = vrot.slane %v2342_v44, %v4456_v25  ;;  %v2572_v43 = vshll.u32 %v4847_v49, 16  ;;  %v1714_v24 = vcombine.high %v4775_v4, %v4775_v4  ;;  %v5210_v42 = vcombine.low %v1875_v63, %v1883_v45  ;;  %2749 = vrot.lane.b32.xlu0 %v5110_v1, %s4276_s19  ;;  %vm5251_vm9 = vmand %vm5221_vm0, %vm1988_vm4 }
 0x155   : > { %v1900_v41 = vcombine.high %v1892_v15, %v1892_v15  ;;  %v2577_v29 = vshll.u32 %v5076_v38, 16  ;;  %v5215_v58 = vcombine.low %v1882_v57, %v1884_v5  ;;  %v1866_v4 = vcombine.high %v1858_v36, %v1858_v36  ;;  %v5267_v5 = vld [vmem:[%s5810_s2 + $0x80] sm:$0xff]   ;;  %vm2047_vm8 = vmand %vm5221_vm0, %vm2023_vm11 }
 0x156   : > { %v2357_v59 = vcombine.low %v2349_v47, %v2356_v18  ;;  %v2358_v63 = vcombine.low %v1850_v39, %v1858_v36  ;;  %v2258_v11 = vrot.slane %v4872_v60, %v4456_v25  ;;  %v1901_v30 = vcombine.high %v1899_v6, %v1899_v6  ;;  %3963 = vmatprep.subr.bf16.mxu0 %v5267_v5 }
 0x157   : > { %v2570_v38 = vshrl.u32 %v4847_v49, 16  ;;  %v2574_v35 = vrot.slane %v2572_v43, 1  ;;  %v2299_v46 = vrot.slane %v1798_v19, %v4456_v25  ;;  %v2359_v34 = vcombine.low %v1866_v4, %v5199_v54 }
 0x158   : > { %v2366_v60 = vrot.slane %v2358_v63, %v4456_v25  ;;  %v2399_v10 = vcombine.low %v1892_v15, %v1900_v41  ;;  %v2579_v53 = vrot.slane %v2577_v29, 1  ;;  %v2217_v62 = vrot.slane %v1714_v24, %v4456_v25 }
 0x159   : > { %v2575_v21 = vor.u32 %v2574_v35, %v2570_v38  ;;  %vm1966_vm2 = vcmp.ge.s32.totalorder %v5192_v16, 1  ;;  %vm1976_vm12 = vcmp.le.s32.totalorder %v5192_v16, 16  ;;  %v2390_v50 = vrot.slane %v5210_v42, %v4456_v25 }
 0x15a   : > { %v2397_v32 = vrot.slane %v5215_v58, %v4456_v25  ;;  %v2373_v28 = vrot.slane %v2359_v34, %v4456_v25  ;;  %v2584_v45 = vshll.u32 %v4895_v8, 16  ;;  %v2400_v7 = vcombine.low %v1899_v6, %v1901_v30  ;;  %vm5324_vm10 = vmand %vm1966_vm2, %vm1976_vm12 }
 0x15b   : > { %v5270_v15 = vsel %vm2544_vm15, %v2575_v21, %v2579_v53  ;;  %v2505_v44 = vsel %vm5232_vm14, %v2217_v62, 0.0  ;;  %v2508_v47 = vsel %vm5243_vm1, %v2258_v11, 0.0  ;;  %v2515_v39 = vsel %vm5251_vm9, %v2357_v59, 0.0  ;;  %vm5353_vm6 = vmand %vm5324_vm10, %vm1988_vm4 }
 0x15c   : > { %v2374_v52 = vcombine.low %v2366_v60, %v2373_v28  ;;  %2645 = vrot.lane.b32.xlu1 %v5270_v15, %s4276_s19  ;;  %v2531_v19 = vpack.c.bf16 %v2505_v44, %v2505_v44  ;;  %v2683_v18 = vrot.slane %v4895_v8, 1  ;;  %v2407_v6 = vrot.slane %v2399_v10, %v4456_v25  ;;  %vm2050_vm13 = vmand %vm5324_vm10, %vm2023_vm11 }
 0x15d   : > { %v2586_v36 = vrot.slane %v2584_v45, 1  ;;  %v1485_v43 = vmul.f32 %v4927_v26, %v4625_v40  ;;  %v1483_v33 = vmul.f32 %v4625_v40, %v4937_v27  ;;  %v2533_v41 = vpack.c.bf16 %v2508_v47, %v2508_v47 }
 0x15e   : > { %v2516_v22 = vsel %vm5221_vm0, %v2374_v52, 0.0  ;;  %v2684_v24 = vrot.slane %v2531_v19, 1  ;;  %v2589_v42 = vshll.u32 %v2531_v19, 16  ;;  %v2582_v58 = vshrl.u32 %v4895_v8, 16 }
 0x15f   : > { %v5293_v29 = vpack.c.bf16 %v2516_v22, %v2515_v39  ;;  %v1515_v26 = vadd.f32 %v4630_v12, %v1485_v43  ;;  %v1513_v59 = vadd.f32 %v4630_v12, %v1483_v33  ;;  %v2414_v27 = vrot.slane %v2400_v7, %v4456_v25 }
 0x160   : > { %v5300_v4 = vsel %vm2673_vm3, %v2683_v18, %v2684_v24  ;;  %v2686_v63 = vrot.slane %v5045_v61, 1  ;;  %v2596_v11 = vshll.u32 %v5045_v61, 16  ;;  %v2587_v20 = vor.u32 %v2586_v36, %v2582_v58 }
 0x161   : > { %2751 = vrot.lane.b32.xlu0 %v5300_v4, %s4276_s19  ;;  %2704 = vrot.lane.b32.xlu1 %v5300_v4, %s4275_s23  ;;  %v1536_v30 = vmax.f32 %v1513_v59, 0.0  ;;  %v2594_v38 = vshrl.u32 %v5045_v61, 16  ;;  %v2511_v35 = vsel %vm2041_vm5, %v2299_v46, 0.0  ;;  %v2591_v14 = vrot.slane %v2589_v42, 1 }
 0x162   : > { %v1538_v34 = vmax.f32 %v1515_v26, 0.0  ;;  %v2598_v60 = vrot.slane %v2596_v11, 1  ;;  %v2601_v57 = vshll.u32 %v2533_v41, 16  ;;  %v5312_v21 = vpack.c.bf16 %v2511_v35, %v2511_v35 }
 0x163   : > { %v1902_v0 = vcombine.high %v1536_v30, %v1536_v30  ;;  %v5310_v10 = vrot.slane %v1536_v30, %v4456_v25  ;;  %v1484_v53 = vmul.f32 %v4625_v40, %v4952_v3  ;;  %v2340_v62 = vrot.slane %v5088_v51, %v4456_v25 }
 0x164   : > { %v2398_v28 = vcombine.low %v2390_v50, %v2397_v32  ;;  %v1867_v46 = vcombine.high %v5199_v54, %v5199_v54  ;;  %v2687_v45 = vrot.slane %v2533_v41, 1  ;;  %v2415_v44 = vcombine.low %v2407_v6, %v2414_v27 }
 0x165   : > { %2792 = vrot.lane.b32.xlu0 %v5270_v15, %s4274_s22  ;;  %2721 = vrot.lane.b32.xlu1 %v5045_v61, %s4274_s22  ;;  %v1916_v40 = vrot.slane %v1902_v0, %v4456_v25  ;;  %v1917_v3 = vcombine.high %v5310_v10, %v5310_v10  ;;  %v5340_v51 = vsel %vm2544_vm15, %v2587_v20, %v2591_v14  ;;  %v2689_v54 = vrot.slane %v5158_v23, 1 }
 0x166   : > { %v5343_v16 = vsel %vm2673_vm3, %v2686_v63, %v2687_v45  ;;  %v1514_v50 = vadd.f32 %v4630_v12, %v1484_v53  ;;  %v1942_v32 = vrot.slane %v1538_v34, %v4456_v25  ;;  %v2599_v47 = vor.u32 %v2598_v60, %v2594_v38 }
 0x167   : > { %v2603_v39 = vrot.slane %v2601_v57, 1  ;;  %v2690_v52 = vrot.slane %v5312_v21, 1  ;;  %v1918_v18 = vcombine.high %v1916_v40, %v1916_v40  ;;  %v2608_v6 = vshll.u32 %v5158_v23, 16 }
 0x168   : > { %v1537_v19 = vmax.f32 %v1514_v50, 0.0  ;;  %v2514_v36 = vsel %vm2044_vm7, %v2340_v62, 0.0  ;;  %v1943_v12 = vcombine.high %v1942_v32, %v1942_v32  ;;  %v2423_v43 = vcombine.low %v1917_v3, %v1916_v40 }
 0x169   : > { %2768 = vrot.lane.b32.xlu0 %v5045_v61, %s4275_s23  ;;  %2647 = vrot.lane.b32.xlu1 %v5340_v51, %s4276_s19  ;;  %v5362_v33 = vpack.c.bf16 %v2514_v36, %v2514_v36  ;;  %v2618_v22 = vshrl.u32 %v5171_v31, 16  ;;  %v2620_v41 = vshll.u32 %v5171_v31, 16  ;;  %v2518_v58 = vsel %vm5353_vm6, %v2398_v28, 0.0 }
 0x16a   : > { %v1919_v24 = vcombine.high %v1537_v19, %v1537_v19  ;;  %v1926_v42 = vrot.slane %v1537_v19, %v4456_v25  ;;  %v2422_v26 = vrot.slane %v5310_v10, %v4456_v25  ;;  %v2613_v59 = vshll.u32 %v5312_v21, 16 }
 0x16b   : > { %v2625_v27 = vshll.u32 %v5362_v33, 16  ;;  %v2519_v63 = vsel %vm5324_vm10, %v2415_v44, 0.0  ;;  %v2622_v38 = vrot.slane %v2620_v41, 1  ;;  %v5385_v35 = vsel %vm2544_vm15, %v2599_v47, %v2603_v39 }
 0x16c   : > { %v1933_v11 = vrot.slane %v1919_v24, %v4456_v25  ;;  %v1934_v20 = vcombine.high %v1926_v42, %v1926_v42  ;;  %v2424_v30 = vcombine.low %v1918_v18, %v1926_v42  ;;  %v5387_v34 = vpack.c.bf16 %v2519_v63, %v2518_v58 }
 0x16d   : > { %2794 = vrot.lane.b32.xlu0 %v5340_v51, %s4274_s22  ;;  %2706 = vrot.lane.b32.xlu1 %v5343_v16, %s4275_s23  ;;  %v2627_v14 = vrot.slane %v2625_v27, 1  ;;  %v2381_v60 = vrot.slane %v1867_v46, %v4456_v25  ;;  %v2431_v57 = vrot.slane %v2423_v43, %v4456_v25  ;;  %v2623_v17 = vor.u32 %v2622_v38, %v2618_v22 }
 0x16e   : > { %v1935_v0 = vcombine.high %v1933_v11, %v1933_v11  ;;  %v2440_v10 = vcombine.low %v1934_v20, %v1933_v11  ;;  %v2438_v53 = vrot.slane %v2424_v30, %v4456_v25  ;;  %v2630_v28 = vshrl.u32 %v5293_v29, 16 }
 0x16f   : > { %v2517_v62 = vsel %vm2047_vm8, %v2381_v60, 0.0  ;;  %v2632_v45 = vshll.u32 %v5293_v29, 16  ;;  %v2463_v44 = vrot.slane %v1943_v12, %v4456_v25  ;;  %v5400_v40 = vsel %vm2544_vm15, %v2623_v17, %v2627_v14 }
 0x170   : > { %v2441_v46 = vcombine.low %v1935_v0, %v1942_v32  ;;  %v5402_v3 = vpack.c.bf16 %v2517_v62, %v2517_v62  ;;  %v2448_v7 = vrot.slane %v2440_v10, %v4456_v25  ;;  %v2520_v47 = vsel %vm2050_vm13, %v2422_v26, 0.0 }
 0x171   : > { %2753 = vrot.lane.b32.xlu0 %v5343_v16, %s4276_s19  ;;  %2770 = vrot.lane.b32.xlu1 %v5158_v23, %s4275_s23  ;;  %v2634_v50 = vrot.slane %v2632_v45, 1  ;;  %v2744_v39 = vrot.slane %v5387_v34, 1  ;;  %v2541_v32 = vpack.c.bf16 %v2520_v47, %v2520_v47  ;;  %v2732_v19 = vshrl.u32 %v5387_v34, 16 }
 0x172   : > { %v2637_v2 = vshll.u32 %v5402_v3, 16  ;;  %v2734_v18 = vshll.u32 %v5387_v34, 16  ;;  %v1953_v12 = vadd.s32 9, %v4641_v48  ;;  %v2439_v43 = vcombine.low %v2431_v57, %v2438_v53 }
 0x173   : > { %v2635_v36 = vor.u32 %v2634_v50, %v2630_v28  ;;  %v2455_v22 = vrot.slane %v2441_v46, %v4456_v25  ;;  %v2610_v24 = vrot.slane %v2608_v6, 1  ;;  %v2745_v41 = vrot.slane %v2541_v32, 1 }
 0x174   : > { %v2639_v42 = vrot.slane %v2637_v2, 1  ;;  %v2736_v58 = vrot.slane %v2734_v18, 1  ;;  %v2739_v26 = vshll.u32 %v2541_v32, 16  ;;  %vm1967_vm0 = vcmp.ge.s32.totalorder %v1953_v12, 1 }
 0x175   : > { %2796 = vrot.lane.b32.xlu0 %v5385_v35, %s4274_s22  ;;  %2723 = vrot.lane.b32.xlu1 %v5158_v23, %s4274_s22  ;;  %vm1977_vm14 = vcmp.le.s32.totalorder %v1953_v12, 16  ;;  %v2456_v27 = vcombine.low %v2448_v7, %v2455_v22  ;;  %v2606_v63 = vshrl.u32 %v5158_v23, 16  ;;  %v5424_v25 = vsel %vm2673_vm3, %v2744_v39, %v2745_v41 }
 0x176   : > { %v5421_v48 = vsel %vm2544_vm15, %v2635_v36, %v2639_v42  ;;  %v2737_v6 = vor.u32 %v2736_v58, %v2732_v19  ;;  %vm1987_vm1 = vmand %vm1967_vm0, %vm1977_vm14  ;;  %v2741_v11 = vrot.slane %v2739_v26, 1  ;;  %v2615_v38 = vrot.slane %v2613_v59, 1 }
 0x177   : > { %vm2018_vm9 = vmand %vm1987_vm1, %vm1988_vm4  ;;  %v2522_v20 = vsel %vm1987_vm1, %v2456_v27, 0.0  ;;  %v2611_v30 = vor.u32 %v2610_v24, %v2606_v63  ;;  %v5442_v9 = vsel %vm2673_vm3, %v2689_v54, %v2690_v52  ;;  %v2692_v59 = vrot.slane %v5171_v31, 1 }
 0x178   : > { %v2521_v14 = vsel %vm2018_vm9, %v2439_v43, 0.0  ;;  %vm2053_vm2 = vmand %vm1987_vm1, %vm2023_vm11  ;;  %v5435_v60 = vsel %vm2544_vm15, %v2737_v6, %v2741_v11  ;;  %v2693_v28 = vrot.slane %v5362_v33, 1  ;;  %v2695_v50 = vrot.slane %v5293_v29, 1 }
 0x179   : > { %2772 = vrot.lane.b32.xlu0 %v5171_v31, %s4275_s23  ;;  %2649 = vrot.lane.b32.xlu1 %v5385_v35, %s4276_s19  ;;  %v2542_v57 = vpack.c.bf16 %v2522_v20, %v2521_v14  ;;  %v2523_v0 = vsel %vm2053_vm2, %v2463_v44, 0.0  ;;  %v5446_v62 = vsel %vm2544_vm15, %v2611_v30, %v2615_v38  ;;  %v2696_v47 = vrot.slane %v5402_v3, 1  ;;  %v4143_v3 = vld [vmem:[%s5811_s3] sm:$0xff]  }
 0x17a   : > { %v2543_v55 = vpack.c.bf16 %v2523_v0, %v2523_v0  ;;  %v5457_v7 = vsel %vm2673_vm3, %v2692_v59, %v2693_v28  ;;  %3983 = vmatprep.subr.bf16.mxu1 %v4143_v3  ;;  %vm2812_vm4 = vcmask 261120   ;;  %vm2829_vm11 = vcmask 523264  }
 0x17b   : > { %v2781_v10 = vshrl.u32 %v2542_v57, 16  ;;  %v2783_v17 = vshll.u32 %v2542_v57, 16  ;;  %v2809_v53 = vrot.slane %v2542_v57, 1  ;;  %v5479_v39 = vsel %vm2673_vm3, %v2695_v50, %v2696_v47 }
 0x17c   : > { %v2788_v45 = vshll.u32 %v2543_v55, 16  ;;  %v2810_v44 = vrot.slane %v2543_v55, 1 }
 0x17d   : > { %2755 = vrot.lane.b32.xlu0 %v5442_v9, %s4276_s19  ;;  %2798 = vrot.lane.b32.xlu1 %v5446_v62, %s4274_s22  ;;  %v2785_v21 = vrot.slane %v2783_v17, 1 }
 0x17e   : > { %v2790_v54 = vrot.slane %v2788_v45, 1  ;;  %v5454_v52 = vsel %vm2673_vm3, %v2809_v53, %v2810_v44 }
 0x17f   : > { %v2786_v46 = vor.u32 %v2785_v21, %v2781_v10 }
 0x181   : > { %2757 = vrot.lane.b32.xlu0 %v5457_v7, %s4276_s19  ;;  %2708 = vrot.lane.b32.xlu1 %v5442_v9, %s4275_s23  ;;  %v2791_v33 = vsel %vm2544_vm15, %v2786_v46, %v2790_v54  ;;  %vm2846_vm15 = vcmask 785408  }
 0x185   : > { %2774 = vrot.lane.b32.xlu0 %v5293_v29, %s4275_s23  ;;  %2725 = vrot.lane.b32.xlu1 %v5171_v31, %s4274_s22 }
 0x189   : > { %2800 = vrot.lane.b32.xlu0 %v5400_v40, %s4274_s22  ;;  %2710 = vrot.lane.b32.xlu1 %v5457_v7, %s4275_s23 }
 0x18d   : > { %2776 = vrot.lane.b32.xlu0 %v5387_v34, %s4275_s23  ;;  %2651 = vrot.lane.b32.xlu1 %v5446_v62, %s4276_s19 }
 0x191   : > { %2759 = vrot.lane.b32.xlu0 %v5479_v39, %s4276_s19  ;;  %2727 = vrot.lane.b32.xlu1 %v5293_v29, %s4274_s22 }
 0x195   : > { %2802 = vrot.lane.b32.xlu0 %v5421_v48, %s4274_s22  ;;  %2653 = vrot.lane.b32.xlu1 %v5400_v40, %s4276_s19 }
 0x199   : > { %2761 = vrot.lane.b32.xlu0 %v5424_v25, %s4276_s19  ;;  %2712 = vrot.lane.b32.xlu1 %v5479_v39, %s4275_s23 }
 0x19d   : > { %2804 = vrot.lane.b32.xlu0 %v5435_v60, %s4274_s22  ;;  %2655 = vrot.lane.b32.xlu1 %v5421_v48, %s4276_s19 }
 0x1a1   : > { %2778 = vrot.lane.b32.xlu0 %v2542_v57, %s4275_s23  ;;  %2729 = vrot.lane.b32.xlu1 %v5387_v34, %s4274_s22  ;;  %v4142_v57 = vld [vmem:[%s5810_s2 + $0x88] sm:$0xff]  }
 0x1a5   : > { %2806 = vrot.lane.b32.xlu0 %v2791_v33, %s4274_s22  ;;  %s364_s22 = sand.u32 1, %s4247_s14  }
 0x1a6   : > { %v2716_v2 = vpop.permute.xlu1 %2715  ;;  %s3755_s24 = sshll.u32 %s364_s22, 7  ;;  %s5756_s23 = scalar_lea.sflag [#allocation3], %s364_s22 }
 0x1a7   : > { %s5672_s25 = scalar_lea.vmem [#allocation2], %s3755_s24  ;;  %s4277_s24 = smov [#allocation2]  }
 0x1a8   : > { %s4181_s28 = sshll.u32 %s4277_s24, 4  ;;  %s4182_s28 = int_to_ptr.vmem [resolvable:$false] %s4181_s28 }
 0x1a9   : > { %s4183_s29 = scalar_lea.vmem %s4182_s28, 4096 }
 0x1af   : > { %v2699_v32 = vpop.permute.xlu0 %2698 }
 0x1b5   : > { %v2701_v19 = vpop.permute.xlu1 %2700 }
 0x1b6   : > { %v2748_v18 = vpop.permute.xlu0 %2747 }
 0x1b7   : > { %v2873_v6 = vsel %vm2812_vm4, %v5174_v56, %v2748_v18 }
 0x1b9   : > { %v2718_v36 = vpop.permute.xlu1 %2717 }
 0x1ba   : > { %v2642_v12 = vpop.permute.xlu0 %2641 }
 0x1bb   : > { %v2814_v34 = vsel %vm2812_vm4, %v4971_v13, %v2642_v12 }
 0x1bc   : > { %v2831_v11 = vsel %vm2829_vm11, %v2814_v34, %v2699_v32 }
 0x1bd   : > { %v2703_v43 = vpop.permute.xlu1 %2702  ;;  %v2848_v13 = vsel %vm2846_vm15, %v2831_v11, %v2716_v2 }
 0x1be   : > { %v2765_v22 = vpop.permute.xlu0 %2764 }
 0x1bf   : > { %v2896_v20 = vsel %vm2829_vm11, %v2873_v6, %v2765_v22 }
 0x1c1   : > { %v2767_v24 = vpop.permute.xlu1 %2766 }
 0x1c2   : > { %v2644_v42 = vpop.permute.xlu0 %2643 }
 0x1c3   : > { %v2816_v56 = vsel %vm2812_vm4, %v4907_v37, %v2644_v42 }
 0x1c4   : > { %v2833_v10 = vsel %vm2829_vm11, %v2816_v56, %v2701_v19 }
 0x1c5   : > { %v2720_v41 = vpop.permute.xlu1 %2719 }
 0x1c6   : > { %v2750_v58 = vpop.permute.xlu0 %2749 }
 0x1c7   : > { %v2876_v59 = vsel %vm2812_vm4, %v5270_v15, %v2750_v58 }
 0x1c8   : > { %v2898_v53 = vsel %vm2829_vm11, %v2876_v59, %v2767_v24 }
 0x1ce   : > { %v2646_v26 = vpop.permute.xlu1 %2645 }
 0x1d3   : > { %v2752_v27 = vpop.permute.xlu0 %2751  ;;  %v2705_v63 = vpop.permute.xlu1 %2704 }
 0x1d4   : > { %v2879_v44 = vsel %vm2812_vm4, %v5340_v51, %v2752_v27 }
 0x1d7   : > { %v2793_v30 = vpop.permute.xlu0 %2792  ;;  %v2722_v38 = vpop.permute.xlu1 %2721 }
 0x1d8   : > { %v2912_v14 = vsel %vm2846_vm15, %v2896_v20, %v2793_v30 }
 0x1d9   : > { %3135 = vmatprep.mubr.bf16.mxu0 %v2912_v14 }
 0x1da   : > { %3136 = vmatmul.mubr.bf16.vlgmr.msra.gmra.mrb[24].mxu0 %v2848_v13 }
 0x1db   : > { %3964 = vmatpush3.bf16.msra.mxu0 %v5267_v5  ;;  %3967 = vmatprep.mubr.msk.bf16.mxu0 %vm2812_vm4, %v5110_v1  ;;  %v2769_v0 = vpop.permute.xlu0 %2768  ;;  %v2648_v55 = vpop.permute.xlu1 %2647  ;;  %v2851_v5 = vsel %vm2846_vm15, %v2833_v10, %v2718_v36  ;;  %v2818_v1 = vsel %vm2812_vm4, %v4847_v49, %v2646_v26 }
 0x1dc   : > { %3965 = vmatprep.subr.bf16.mxu0 %v4142_v57  ;;  %v2835_v21 = vsel %vm2829_vm11, %v2818_v1, %v2703_v43  ;;  %v2900_v54 = vsel %vm2829_vm11, %v2879_v44, %v2769_v0 }
 0x1dd   : > { %v2854_v49 = vsel %vm2846_vm15, %v2835_v21, %v2720_v41 }
 0x1df   : > { %3966 = vmatpush3.bf16.msra.mxu0 %v4142_v57  ;;  %v2795_v17 = vpop.permute.xlu0 %2794  ;;  %v2707_v28 = vpop.permute.xlu1 %2706 }
 0x1e0   : > { %v2915_v37 = vsel %vm2846_vm15, %v2898_v53, %v2795_v17 }
 0x1e1   : > { %3143 = vmatprep.mubr.bf16.mxu1 %v2915_v37 }
 0x1e2   : > { %3144 = vmatmul.mubr.bf16.vlgmr.msra.gmra.mrb[0].mxu1 %v2851_v5  ;;  %3968 = vmatmul.mubr.msk.bf16.vlgmr.msra.gmra.mrb[28].mxu0 %vm2812_vm4, %v5300_v4 }
 0x1e3   : > { %v2754_v15 = vpop.permute.xlu0 %2753  ;;  %3971 = vmatprep.mubr.msk.bf16.mxu0 %vm2812_vm4, %v5343_v16  ;;  %v2771_v45 = vpop.permute.xlu1 %2770  ;;  %3984 = vmatpush3.bf16.msra.mxu1 %v4143_v3  ;;  %v2820_v16 = vsel %vm2812_vm4, %v4895_v8, %v2648_v55 }
 0x1e4   : > { %v2882_v47 = vsel %vm2812_vm4, %v5385_v35, %v2754_v15  ;;  %v2837_v3 = vsel %vm2829_vm11, %v2820_v16, %v2705_v63  ;;  %v4144_v15 = vld [vmem:[%s5811_s3 + $0x8] sm:$0xff]  }
 0x1e5   : > { %v2902_v2 = vsel %vm2829_vm11, %v2882_v47, %v2771_v45  ;;  %3985 = vmatprep.subr.bf16.mxu1 %v4144_v15 }
 0x1e7   : > { %v2797_v46 = vpop.permute.xlu0 %2796  ;;  %v2724_v33 = vpop.permute.xlu1 %2723  ;;  %3986 = vmatpush3.bf16.msra.mxu1 %v4144_v15 }
 0x1e8   : > { %v2918_v4 = vsel %vm2846_vm15, %v2900_v54, %v2797_v46 }
 0x1e9   : > { %3151 = vmatprep.mubr.bf16.mxu1 %v2918_v4 }
 0x1ea   : > { %3152 = vmatmul.mubr.bf16.gmra.mrb[4].mxu1 %v2854_v49  ;;  %3972 = vmatmul.mubr.msk.bf16.gmra.mrb[32].mxu0 %vm2812_vm4, %v5442_v9  ;;  %v2857_v9 = vsel %vm2846_vm15, %v2837_v3, %v2722_v38  ;;  %v5594_v49 = vld [vmem:[%s5814_s6] ss:$0 sm:$0xff] }
 0x1eb   : > { %v2773_v50 = vpop.permute.xlu0 %2772  ;;  %3975 = vmatprep.mubr.msk.bf16.mxu0 %vm2812_vm4, %v5457_v7  ;;  %v2650_v51 = vpop.permute.xlu1 %2649 }
 0x1ec   : > { %v2822_v7 = vsel %vm2812_vm4, %v5045_v61, %v2650_v51 }
 0x1ed   : > { %v2839_v22 = vsel %vm2829_vm11, %v2822_v7, %v2707_v28 }
 0x1ee   : > { %v2860_v41 = vsel %vm2846_vm15, %v2839_v22, %v2724_v33 }
 0x1ef   : > { %v2756_v32 = vpop.permute.xlu0 %2755  ;;  %v2799_v19 = vpop.permute.xlu1 %2798 }
 0x1f0   : > { %v2921_v18 = vsel %vm2846_vm15, %v2902_v2, %v2799_v19  ;;  %v2885_v43 = vsel %vm2812_vm4, %v5446_v62, %v2756_v32  ;;  %v5599_v2 = vld [vmem:[%s5815_s7] ss:$0 sm:$0xff] }
 0x1f1   : > { %3159 = vmatprep.mubr.bf16.mxu1 %v2921_v18  ;;  %v2904_v24 = vsel %vm2829_vm11, %v2885_v43, %v2773_v50 }
 0x1f2   : > { %3976 = vmatmul.mubr.msk.bf16.gmra.mrb[36].mxu0 %vm2812_vm4, %v5479_v39  ;;  %3160 = vmatmul.mubr.bf16.gmra.mrb[8].mxu1 %v2857_v9 }
 0x1f3   : > { %v2758_v8 = vpop.permute.xlu0 %2757  ;;  %3979 = vmatprep.mubr.msk.bf16.mxu0 %vm2812_vm4, %v5424_v25  ;;  %v2709_v35 = vpop.permute.xlu1 %2708 }
 0x1f7   : > { %v2775_v36 = vpop.permute.xlu0 %2774  ;;  %v2726_v12 = vpop.permute.xlu1 %2725 }
 0x1fa   : > { %3980 = vmatmul.mubr.msk.bf16.gmra.mrb[40].mxu0 %vm2812_vm4, %v5454_v52  ;;  %v2888_v52 = vsel %vm2812_vm4, %v5400_v40, %v2758_v8 }
 0x1fb   : > { %v2801_v39 = vpop.permute.xlu0 %2800  ;;  %v2711_v42 = vpop.permute.xlu1 %2710  ;;  %v2906_v63 = vsel %vm2829_vm11, %v2888_v52, %v2775_v36 }
 0x1fc   : > { %v2924_v25 = vsel %vm2846_vm15, %v2904_v24, %v2801_v39 }
 0x1fd   : > { %3167 = vmatprep.mubr.bf16.mxu1 %v2924_v25 }
 0x1fe   : > { %3168 = vmatmul.mubr.bf16.gmra.mrb[12].mxu1 %v2860_v41 }
 0x1ff   : > { %v2777_v61 = vpop.permute.xlu0 %2776  ;;  %v2652_v58 = vpop.permute.xlu1 %2651 }
 0x200   : > { %v2824_v62 = vsel %vm2812_vm4, %v5158_v23, %v2652_v58 }
 0x201   : > { %v2841_v27 = vsel %vm2829_vm11, %v2824_v62, %v2709_v35 }
 0x202   : > { %v2863_v30 = vsel %vm2846_vm15, %v2841_v27, %v2726_v12 }
 0x203   : > { %v2760_v26 = vpop.permute.xlu0 %2759  ;;  %v2728_v34 = vpop.permute.xlu1 %2727 }
 0x204   : > { %v2891_v40 = vsel %vm2812_vm4, %v5421_v48, %v2760_v26 }
 0x205   : > { %v2908_v56 = vsel %vm2829_vm11, %v2891_v40, %v2777_v61 }
 0x207   : > { %v2803_v6 = vpop.permute.xlu0 %2802  ;;  %v2654_v11 = vpop.permute.xlu1 %2653 }
 0x208   : > { %v2927_v20 = vsel %vm2846_vm15, %v2906_v63, %v2803_v6  ;;  %v2826_v23 = vsel %vm2812_vm4, %v5171_v31, %v2654_v11 }
 0x209   : > { %3175 = vmatprep.mubr.bf16.mxu1 %v2927_v20  ;;  %v2843_v57 = vsel %vm2829_vm11, %v2826_v23, %v2711_v42 }
 0x20a   : > { %3176 = vmatmul.mubr.bf16.gmra.mrb[16].mxu1 %v2863_v30  ;;  %v2866_v59 = vsel %vm2846_vm15, %v2843_v57, %v2728_v34 }
 0x20b   : > { %v2762_v38 = vpop.permute.xlu0 %2761  ;;  %v2713_v14 = vpop.permute.xlu1 %2712 }
 0x20c   : > { %v2894_v17 = vsel %vm2812_vm4, %v5435_v60, %v2762_v38 }
 0x20f   : > { %v2805_v13 = vpop.permute.xlu0 %2804  ;;  %v2656_v55 = vpop.permute.xlu1 %2655 }
 0x210   : > { %v2930_v0 = vsel %vm2846_vm15, %v2908_v56, %v2805_v13  ;;  %v2828_v31 = vsel %vm2812_vm4, %v5293_v29, %v2656_v55 }
 0x211   : > { %3183 = vmatprep.mubr.bf16.mxu1 %v2930_v0  ;;  %v2845_v5 = vsel %vm2829_vm11, %v2828_v31, %v2713_v14 }
 0x212   : > { %3184 = vmatmul.mubr.bf16.gmra.mrb[20].mxu1 %v2866_v59 }
 0x213   : > { %v2779_v10 = vpop.permute.xlu0 %2778  ;;  %v2730_v48 = vpop.permute.xlu1 %2729 }
 0x214   : > { %v2910_v53 = vsel %vm2829_vm11, %v2894_v17, %v2779_v10  ;;  %v2869_v1 = vsel %vm2846_vm15, %v2845_v5, %v2730_v48 }
 0x217   : > { %v2807_v28 = vpop.permute.xlu0 %2806 }
 0x218   : > { %v2933_v37 = vsel %vm2846_vm15, %v2910_v53, %v2807_v28 }
 0x219   : > { %3191 = vmatprep.mubr.bf16.mxu1 %v2933_v37 }
 0x21a   : > { %3192 = vmatmul.mubr.bf16.gmra.mrb[24].mxu1 %v2869_v1 }
 0x2ad   : > { %v3855_v29 = vpop.f32.mrb[24].mxu0 }
 0x2ae   : > { %v3856_v60 = vpop.f32.mrb[25].mxu0 }
 0x2af   : > { %v3857_v45 = vadd.f32 %v3856_v60, %v3855_v29  ;;  %v3858_v44 = vpop.f32.mrb[26].mxu0 }
 0x2b0   : > { %v3859_v21 = vpop.f32.mrb[27].mxu0 }
 0x2b1   : > { %v3860_v54 = vadd.f32 %v3859_v21, %v3858_v44 }
 0x2b5   : > { %v3861_v46 = vpop.f32.mrb[0].mxu1  ;;  %v3969_v33 = vpop.f32.mrb[28].mxu0 }
 0x2b6   : > { %v3862_v4 = vpop.f32.mrb[1].mxu1  ;;  %v3234_v16 = vpop.f32.mrb[29].mxu0 }
 0x2b7   : > { %v3863_v50 = vadd.f32 %v3862_v4, %v3861_v46  ;;  %v3235_v51 = vadd.f32 %v3857_v45, %v3234_v16  ;;  %v3864_v47 = vpop.f32.mrb[2].mxu1  ;;  %v3970_v3 = vpop.f32.mrb[30].mxu0 }
 0x2b8   : > { %v3865_v32 = vpop.f32.mrb[3].mxu1  ;;  %v3237_v19 = vpop.f32.mrb[31].mxu0 }
 0x2b9   : > { %v3243_v18 = vadd.f32 %v3969_v33, %v3863_v50  ;;  %v3304_v9 = vmul.f32 %v5594_v49, %v3235_v51  ;;  %v3866_v8 = vadd.f32 %v3865_v32, %v3864_v47  ;;  %v3238_v35 = vadd.f32 %v3860_v54, %v3237_v19 }
 0x2bb   : > { %v3306_v7 = vmul.f32 %v5594_v49, %v3243_v18  ;;  %v3327_v36 = vadd.f32 %v5599_v2, %v3304_v9  ;;  %v3246_v12 = vadd.f32 %v3970_v3, %v3866_v8  ;;  %v3305_v43 = vmul.f32 %v5594_v49, %v3238_v35 }
 0x2bd   : > { %v3329_v22 = vadd.f32 %v5599_v2, %v3306_v7  ;;  %v3307_v39 = vmul.f32 %v5594_v49, %v3246_v12  ;;  %v3328_v24 = vadd.f32 %v5599_v2, %v3305_v43  ;;  %v3867_v42 = vpop.f32.mrb[4].mxu1  ;;  %v3973_v25 = vpop.f32.mrb[32].mxu0  ;;  %v3343_v58 = vmax.f32 %v3327_v36, 0.0 }
 0x2be   : > { %v3868_v41 = vpop.f32.mrb[5].mxu1  ;;  %v3250_v61 = vpop.f32.mrb[33].mxu0 }
 0x2bf   : > { %v3330_v62 = vadd.f32 %v5599_v2, %v3307_v39  ;;  %v3344_v26 = vmax.f32 %v3328_v24, 0.0  ;;  %v3869_v34 = vadd.f32 %v3868_v41, %v3867_v42  ;;  %v3870_v52 = vpop.f32.mrb[6].mxu1  ;;  %v3974_v27 = vpop.f32.mrb[34].mxu0  ;;  %v3345_v63 = vmax.f32 %v3329_v22, 0.0 }
 0x2c0   : > { %v3871_v6 = vpop.f32.mrb[7].mxu1  ;;  %v3253_v11 = vpop.f32.mrb[35].mxu0 }
 0x2c1   : > { %v3346_v20 = vmax.f32 %v3330_v62, 0.0  ;;  %v3359_v30 = vpack.c.bf16 %v3344_v26, %v3343_v58  ;;  %v3251_v23 = vadd.f32 %v3869_v34, %v3250_v61  ;;  %v3872_v38 = vadd.f32 %v3871_v6, %v3870_v52 }
 0x2c3   : > { %v3360_v14 = vpack.c.bf16 %v3346_v20, %v3345_v63  ;;  %v3308_v40 = vmul.f32 %v5594_v49, %v3251_v23  ;;  %v3254_v57 = vadd.f32 %v3872_v38, %v3253_v11  ;;  %3987 = vmatprep.mubr.msk.bf16.mxu1 %vm2812_vm4, %v3359_v30 }
 0x2c5   : > { %v3331_v13 = vadd.f32 %v5599_v2, %v3308_v40  ;;  %v3309_v56 = vmul.f32 %v5594_v49, %v3254_v57  ;;  %v3977_v0 = vpop.f32.mrb[36].mxu0  ;;  %3988 = vmatmul.mubr.msk.bf16.vlgmr.msra.gmra.mrb[28].mxu1 %vm2812_vm4, %v3360_v14  ;;  %v3873_v55 = vpop.f32.mrb[8].mxu1 }
 0x2c6   : > { %v3266_v59 = vpop.f32.mrb[37].mxu0  ;;  %v3874_v10 = vpop.f32.mrb[9].mxu1 }
 0x2c7   : > { %v3332_v31 = vadd.f32 %v5599_v2, %v3309_v56  ;;  %v3978_v17 = vpop.f32.mrb[38].mxu0  ;;  %v3875_v48 = vadd.f32 %v3874_v10, %v3873_v55  ;;  %v3876_v53 = vpop.f32.mrb[10].mxu1  ;;  %v3347_v5 = vmax.f32 %v3331_v13, 0.0 }
 0x2c8   : > { %v3269_v28 = vpop.f32.mrb[39].mxu0  ;;  %v3877_v37 = vpop.f32.mrb[11].mxu1 }
 0x2c9   : > { %v3348_v1 = vmax.f32 %v3332_v31, 0.0  ;;  %v3259_v15 = vadd.f32 %v3973_v25, %v3875_v48  ;;  %v3878_v29 = vadd.f32 %v3877_v37, %v3876_v53 }
 0x2cb   : > { %v3361_v60 = vpack.c.bf16 %v3348_v1, %v3347_v5  ;;  %v3310_v45 = vmul.f32 %v5594_v49, %v3259_v15  ;;  %v3262_v44 = vadd.f32 %v3974_v27, %v3878_v29 }
 0x2cd   : > { %v3333_v21 = vadd.f32 %v5599_v2, %v3310_v45  ;;  %v3311_v54 = vmul.f32 %v5594_v49, %v3262_v44  ;;  %v3981_v46 = vpop.f32.mrb[40].mxu0  ;;  %3991 = vmatprep.mubr.msk.bf16.mxu1 %vm2812_vm4, %v3361_v60 }
 0x2ce   : > { %v3282_v33 = vpop.f32.mrb[41].mxu0 }
 0x2cf   : > { %v3334_v4 = vadd.f32 %v5599_v2, %v3311_v54  ;;  %v3982_v16 = vpop.f32.mrb[42].mxu0  ;;  %v3349_v51 = vmax.f32 %v3333_v21, 0.0 }
 0x2d0   : > { %v3285_v50 = vpop.f32.mrb[43].mxu0 }
 0x2d1   : > { %v3350_v47 = vmax.f32 %v3334_v4, 0.0  ;;  %v3879_v3 = vpop.f32.mrb[12].mxu1 }
 0x2d2   : > { %v3880_v32 = vpop.f32.mrb[13].mxu1 }
 0x2d3   : > { %v3881_v19 = vadd.f32 %v3880_v32, %v3879_v3  ;;  %v3882_v18 = vpop.f32.mrb[14].mxu1  ;;  %v3362_v9 = vpack.c.bf16 %v3350_v47, %v3349_v51  ;;  %v4145_v3 = vld [vmem:[%s4421_s18 + $0x30] sm:$0xff] }
 0x2d4   : > { %v3883_v8 = vpop.f32.mrb[15].mxu1  ;;  %v3556_v32 = vrot.slane %v4145_v3, 1 }
 0x2d5   : > { %v3267_v35 = vadd.f32 %v3881_v19, %v3266_v59  ;;  %v3884_v7 = vadd.f32 %v3883_v8, %v3882_v18  ;;  %3992 = vmatmul.mubr.msk.bf16.gmra.mrb[32].mxu1 %vm2812_vm4, %v3362_v9  ;;  %v4147_v18 = vld [vmem:[%s4421_s18 + $0x18] sm:$0xff] }
 0x2d6   : > { %v3551_v9 = vrot.slane %v4147_v18, 1 }
 0x2d7   : > { %v3312_v36 = vmul.f32 %v5594_v49, %v3267_v35  ;;  %v3270_v12 = vadd.f32 %v3884_v7, %v3269_v28  ;;  %v5654_v7 = vld [vmem:[%s5817_s9] ss:$0 sm:$0xff] }
 0x2d9   : > { %v3335_v43 = vadd.f32 %v5599_v2, %v3312_v36  ;;  %v3313_v22 = vmul.f32 %v5594_v49, %v3270_v12  ;;  %v4149_v36 = vld [vmem:[%s4421_s18 + $0x40] sm:$0x3] }
 0x2da   : > { %v3559_v12 = vrot.slane %v4149_v36, 1 }
 0x2db   : > { %v3336_v39 = vadd.f32 %v5599_v2, %v3313_v22  ;;  %v3351_v24 = vmax.f32 %v3335_v43, 0.0 }
 0x2dd   : > { %v3352_v42 = vmax.f32 %v3336_v39, 0.0  ;;  %v3885_v25 = vpop.f32.mrb[16].mxu1  ;;  %v4150_v39 = vld [vmem:[%s4421_s18 + $0x28] sm:$0x3] }
 0x2de   : > { %v3886_v41 = vpop.f32.mrb[17].mxu1 }
 0x2df   : > { %v3887_v61 = vadd.f32 %v3886_v41, %v3885_v25  ;;  %v3888_v58 = vpop.f32.mrb[18].mxu1  ;;  %v3363_v62 = vpack.c.bf16 %v3352_v42, %v3351_v24  ;;  %v3554_v24 = vrot.slane %v4150_v39, 1 }
 0x2e0   : > { %v3889_v26 = vpop.f32.mrb[19].mxu1 }
 0x2e1   : > { %v3275_v34 = vadd.f32 %v3977_v0, %v3887_v61  ;;  %v3890_v52 = vadd.f32 %v3889_v26, %v3888_v58  ;;  %3995 = vmatprep.mubr.msk.bf16.mxu1 %vm2812_vm4, %v3363_v62 }
 0x2e3   : > { %v3314_v27 = vmul.f32 %v5594_v49, %v3275_v34  ;;  %v3278_v63 = vadd.f32 %v3978_v17, %v3890_v52 }
 0x2e5   : > { %v3337_v6 = vadd.f32 %v5599_v2, %v3314_v27  ;;  %v3315_v11 = vmul.f32 %v5594_v49, %v3278_v63  ;;  %v3891_v20 = vpop.f32.mrb[20].mxu1 }
 0x2e6   : > { %v3892_v30 = vpop.f32.mrb[21].mxu1 }
 0x2e7   : > { %v3338_v23 = vadd.f32 %v5599_v2, %v3315_v11  ;;  %v3893_v38 = vadd.f32 %v3892_v30, %v3891_v20  ;;  %v3894_v14 = vpop.f32.mrb[22].mxu1  ;;  %v3353_v57 = vmax.f32 %v3337_v6, 0.0 }
 0x2e8   : > { %v3895_v40 = vpop.f32.mrb[23].mxu1 }
 0x2e9   : > { %v3354_v13 = vmax.f32 %v3338_v23, 0.0  ;;  %v3283_v56 = vadd.f32 %v3893_v38, %v3282_v33  ;;  %v3896_v0 = vadd.f32 %v3895_v40, %v3894_v14 }
 0x2eb   : > { %v3316_v55 = vmul.f32 %v5594_v49, %v3283_v56  ;;  %v3286_v59 = vadd.f32 %v3896_v0, %v3285_v50  ;;  %v3364_v10 = vpack.c.bf16 %v3354_v13, %v3353_v57  ;;  %v4151_v56 = vld [vmem:[%s4421_s18 + $0x60] sm:$0xff] }
 0x2ec   : > { %v3566_v0 = vrot.slane %v4151_v56, 1 }
 0x2ed   : > { %v3339_v31 = vadd.f32 %v5599_v2, %v3316_v55  ;;  %v3317_v17 = vmul.f32 %v5594_v49, %v3286_v59  ;;  %v3897_v48 = vpop.f32.mrb[24].mxu1  ;;  %3996 = vmatmul.mubr.msk.bf16.gmra.mrb[36].mxu1 %vm2812_vm4, %v3364_v10  ;;  %v4152_v55 = vld [vmem:[%s4421_s18 + $0x68] sm:$0xff] }
 0x2ee   : > { %v3898_v53 = vpop.f32.mrb[25].mxu1  ;;  %v3567_v59 = vrot.slane %v4152_v55, 1  ;;  %v4153_v10 = vld [vmem:[%s4421_s18 + $0x48] sm:$0xff] }
 0x2ef   : > { %v3340_v28 = vadd.f32 %v5599_v2, %v3317_v17  ;;  %v3899_v37 = vadd.f32 %v3898_v53, %v3897_v48  ;;  %v3900_v5 = vpop.f32.mrb[26].mxu1  ;;  %v3355_v15 = vmax.f32 %v3339_v31, 0.0  ;;  %v3561_v31 = vrot.slane %v4153_v10, 1  ;;  %v4154_v17 = vld [vmem:[%s4421_s18 + $0x50] sm:$0xff] }
 0x2f0   : > { %v3901_v1 = vpop.f32.mrb[27].mxu1  ;;  %v3562_v48 = vrot.slane %v4154_v17, 1 }
 0x2f1   : > { %v3356_v29 = vmax.f32 %v3340_v28, 0.0  ;;  %v3291_v60 = vadd.f32 %v3981_v46, %v3899_v37  ;;  %v3902_v45 = vadd.f32 %v3901_v1, %v3900_v5  ;;  %v4155_v28 = vld [vmem:[%s4421_s18 + $0x70] sm:$0x3] }
 0x2f2   : > { %v3569_v37 = vrot.slane %v4155_v28, 1 }
 0x2f3   : > { %v3318_v44 = vmul.f32 %v5594_v49, %v3291_v60  ;;  %v3294_v21 = vadd.f32 %v3982_v16, %v3902_v45  ;;  %v3365_v54 = vpack.c.bf16 %v3356_v29, %v3355_v15  ;;  %v5644_v16 = vld [vmem:[%s5816_s8] ss:$0 sm:$0xff]  ;;  %v4156_v15 = vld [vmem:[%s4421_s18 + $0x58] sm:$0x3]  ;;  %v3568_v60 = vsel %vm2673_vm3, %v3566_v0, %v3567_v59 }
 0x2f4   : > { %v3564_v29 = vrot.slane %v4156_v15, 1 }
 0x2f5   : > { %v3341_v33 = vadd.f32 %v5599_v2, %v3318_v44  ;;  %v3319_v4 = vmul.f32 %v5594_v49, %v3294_v21  ;;  %3999 = vmatprep.mubr.msk.bf16.mxu1 %vm2812_vm4, %v3365_v54  ;;  %v4146_v49 = vld [vmem:[%s4421_s18 + $0x38] sm:$0xff]  ;;  %v3563_v54 = vsel %vm2673_vm3, %v3561_v31, %v3562_v48 }
 0x2f6   : > { %v3557_v19 = vrot.slane %v4146_v49, 1 }
 0x2f7   : > { %v3342_v50 = vadd.f32 %v5599_v2, %v3319_v4  ;;  %v3357_v51 = vmax.f32 %v3341_v33, 0.0  ;;  %v4148_v2 = vld [vmem:[%s4421_s18 + $0x20] sm:$0xff] }
 0x2f8   : > { %v3552_v8 = vrot.slane %v4148_v2, 1  ;;  %v3558_v42 = vsel %vm2673_vm3, %v3556_v32, %v3557_v19  ;;  %v3560_v52 = vsel %vm2673_vm3, %v3557_v19, %v3559_v12  ;;  %v3565_v32 = vsel %vm2673_vm3, %v3562_v48, %v3564_v29  ;;  %v4157_v12 = vld [vmem:[%s4421_s18 + $0x90] sm:$0xff]  ;;  %v4165_v29 = vld [vmem:[%s4421_s18 + $0xa8] sm:$0xff] }
 0x2f9   : > { %v3358_v46 = vmax.f32 %v3342_v50, 0.0 }
 0x2fa   : > { %v3553_v58 = vsel %vm2673_vm3, %v3551_v9, %v3552_v8  ;;  %v3555_v11 = vsel %vm2673_vm3, %v3552_v8, %v3554_v24  ;;  %v4159_v24 = vld [vmem:[%s4421_s18 + $0x78] sm:$0xff] }
 0x2fb   : > { %v3366_v47 = vpack.c.bf16 %v3358_v46, %v3357_v51  ;;  %v3570_v51 = vsel %vm2673_vm3, %v3567_v59, %v3569_v37  ;;  %v4163_v37 = vld [vmem:[%s4421_s18 + $0xc0] sm:$0xff] }
 0x2fd   : > { %4000 = vmatmul.mubr.msk.bf16.gmra.mrb[40].mxu1 %vm2812_vm4, %v3366_v47 }
 0x398   : > { %v3989_v35 = vpop.f32.mrb[28].mxu1 }
 0x399   : > { %v3513_v43 = vmul.f32 %v3989_v35, %v5644_v16  ;;  %v3441_v22 = vpop.f32.mrb[29].mxu1 }
 0x39a   : > { %v3511_v25 = vmul.f32 %v5644_v16, %v3441_v22  ;;  %v3990_v41 = vpop.f32.mrb[30].mxu1  ;;  %v4158_v22 = vld [vmem:[%s4421_s18 + $0x98] sm:$0xff] }
 0x39b   : > { %v3536_v61 = vadd.f32 %v5654_v7, %v3513_v43  ;;  %v3514_v62 = vmul.f32 %v3990_v41, %v5644_v16  ;;  %v3444_v26 = vpop.f32.mrb[31].mxu1  ;;  %v3576_v43 = vrot.slane %v4157_v12, 1  ;;  %v3577_v39 = vrot.slane %v4158_v22, 1 }
 0x39c   : > { %v3534_v34 = vadd.f32 %v5654_v7, %v3511_v25  ;;  %v3512_v27 = vmul.f32 %v5644_v16, %v3444_v26  ;;  %v4160_v25 = vld [vmem:[%s4421_s18 + $0x80] sm:$0xff] }
 0x39d   : > { %v3609_v63 = vadd.f32 %v3558_v42, %v3536_v61  ;;  %v3537_v6 = vadd.f32 %v5654_v7, %v3514_v62  ;;  %v3571_v42 = vrot.slane %v4159_v24, 1  ;;  %v3572_v41 = vrot.slane %v4160_v25, 1 }
 0x39e   : > { %v3607_v20 = vadd.f32 %v3553_v58, %v3534_v34  ;;  %v3535_v30 = vadd.f32 %v5654_v7, %v3512_v27  ;;  %v4161_v58 = vld [vmem:[%s4421_s18 + $0xa0] sm:$0x3] }
 0x39f   : > { %v3625_v23 = vmax.f32 %v3609_v63, 0.0  ;;  %v3610_v38 = vadd.f32 %v3560_v52, %v3537_v6  ;;  %v3579_v62 = vrot.slane %v4161_v58, 1  ;;  %v4162_v52 = vld [vmem:[%s4421_s18 + $0x88] sm:$0x3]  ;;  %v3578_v63 = vsel %vm2673_vm3, %v3576_v43, %v3577_v39 }
 0x3a0   : > { %v3623_v14 = vmax.f32 %v3607_v20, 0.0  ;;  %v3608_v40 = vadd.f32 %v3555_v11, %v3535_v30  ;;  %v3574_v27 = vrot.slane %v4162_v52, 1  ;;  %v3573_v30 = vsel %vm2673_vm3, %v3571_v42, %v3572_v41 }
 0x3a1   : > { %3641 = vst [vmem:[%s5672_s25 + $0x10] sm:$0xff] %v3625_v23  ;;  %v3626_v57 = vmax.f32 %v3610_v38, 0.0 }
 0x3a2   : > { %3639 = vst [vmem:[%s5672_s25] sm:$0xff] %v3623_v14  ;;  %v3624_v13 = vmax.f32 %v3608_v40, 0.0  ;;  %v3580_v40 = vsel %vm2673_vm3, %v3577_v39, %v3579_v62  ;;  %v3575_v0 = vsel %vm2673_vm3, %v3572_v41, %v3574_v27 }
 0x3a3   : > { %3642 = vst [vmem:[%s5672_s25 + $0x18] sm:$0xff] %v3626_v57 }
 0x3a4   : > { %3640 = vst [vmem:[%s5672_s25 + $0x8] sm:$0xff] %v3624_v13 }
 0x3a8   : > { %v3993_v53 = vpop.f32.mrb[32].mxu1 }
 0x3a9   : > { %v3517_v5 = vmul.f32 %v3993_v53, %v5644_v16  ;;  %v3457_v1 = vpop.f32.mrb[33].mxu1 }
 0x3aa   : > { %v3515_v45 = vmul.f32 %v5644_v16, %v3457_v1  ;;  %v3994_v44 = vpop.f32.mrb[34].mxu1  ;;  %v4164_v1 = vld [vmem:[%s4421_s18 + $0xc8] sm:$0xff] }
 0x3ab   : > { %v3540_v21 = vadd.f32 %v5654_v7, %v3517_v5  ;;  %v3518_v33 = vmul.f32 %v3994_v44, %v5644_v16  ;;  %v3460_v4 = vpop.f32.mrb[35].mxu1  ;;  %v3586_v5 = vrot.slane %v4163_v37, 1  ;;  %v3587_v15 = vrot.slane %v4164_v1, 1 }
 0x3ac   : > { %v3538_v50 = vadd.f32 %v5654_v7, %v3515_v45  ;;  %v3516_v46 = vmul.f32 %v5644_v16, %v3460_v4  ;;  %v4166_v45 = vld [vmem:[%s4421_s18 + $0xb0] sm:$0xff] }
 0x3ad   : > { %v3613_v47 = vadd.f32 %v3568_v60, %v3540_v21  ;;  %v3541_v3 = vadd.f32 %v5654_v7, %v3518_v33  ;;  %v3581_v60 = vrot.slane %v4165_v29, 1  ;;  %v3582_v44 = vrot.slane %v4166_v45, 1 }
 0x3ae   : > { %v3611_v49 = vadd.f32 %v3563_v54, %v3538_v50  ;;  %v3539_v19 = vadd.f32 %v5654_v7, %v3516_v46  ;;  %v4167_v54 = vld [vmem:[%s4421_s18 + $0xd0] sm:$0x3] }
 0x3af   : > { %v3629_v18 = vmax.f32 %v3613_v47, 0.0  ;;  %v3614_v9 = vadd.f32 %v3570_v51, %v3541_v3  ;;  %v3589_v33 = vrot.slane %v4167_v54, 1  ;;  %v4168_v51 = vld [vmem:[%s4421_s18 + $0xb8] sm:$0x3]  ;;  %v3588_v47 = vsel %vm2673_vm3, %v3586_v5, %v3587_v15  ;;  %s3672_s18 = sshll.u32 %s5672_s25, 4  ;;  %s5749_s18 = int_to_ptr.vmem [resolvable:$true] %s3672_s18 }
 0x3b0   : > { %v3627_v2 = vmax.f32 %v3611_v49, 0.0  ;;  %v3612_v8 = vadd.f32 %v3565_v32, %v3539_v19  ;;  %v3584_v46 = vrot.slane %v4168_v51, 1  ;;  %v3583_v19 = vsel %vm2673_vm3, %v3581_v60, %v3582_v44  ;;  %s4177_s19 = scalar_lea.vmem %s5749_s18, 2048  ;;  %p4184_p2 = scmp.lt.s32.totalorder %s5749_s18, %s4182_s28 }
 0x3b1   : > { %3645 = vst [vmem:[%s5672_s25 + $0x30] sm:$0xff] %v3629_v18  ;;  %v3630_v35 = vmax.f32 %v3614_v9, 0.0  ;;  %p4178_p13 = scmp.ne.s32.totalorder %s5749_s18, %s4177_s19  ;;  %p4185_p4 = scmp.lt.s32.totalorder %s4183_s29, %s4177_s19 }
 0x3b2   : > { %3643 = vst [vmem:[%s5672_s25 + $0x20] sm:$0xff] %v3627_v2  ;;  %v3628_v36 = vmax.f32 %v3612_v8, 0.0  ;;  %v3590_v8 = vsel %vm2673_vm3, %v3587_v15, %v3589_v33  ;;  %v3585_v43 = vsel %vm2673_vm3, %v3582_v44, %v3584_v46 }
 0x3b3   : > { %3646 = vst [vmem:[%s5672_s25 + $0x38] sm:$0xff] %v3630_v35  ;;  %p4179_p0 = pnand %p4178_p13, %p4386_p3  ;;  %p4186_p5 = por %p4185_p4, %p4184_p2 }
 0x3b4   : > { %3644 = vst [vmem:[%s5672_s25 + $0x28] sm:$0xff] %v3628_v36 }
 0x3b5   : > { %p4180_p1 = pneg %p4179_p0 }
 0x3b7   : > { %p4187_p6 = pnand %p4186_p5, %p4180_p1 }
 0x3c0   : > { %v3997_v61 = vpop.f32.mrb[36].mxu1 }
 0x3c1   : > { %v3521_v26 = vmul.f32 %v3997_v61, %v5644_v16  ;;  %v3473_v34 = vpop.f32.mrb[37].mxu1 }
 0x3c2   : > { %v3519_v6 = vmul.f32 %v5644_v16, %v3473_v34  ;;  %v3998_v11 = vpop.f32.mrb[38].mxu1 }
 0x3c3   : > { %v3544_v20 = vadd.f32 %v5654_v7, %v3521_v26  ;;  %v3522_v23 = vmul.f32 %v3998_v11, %v5644_v16  ;;  %v3476_v38 = vpop.f32.mrb[39].mxu1 }
 0x3c4   : > { %v3542_v14 = vadd.f32 %v5654_v7, %v3519_v6  ;;  %v3520_v57 = vmul.f32 %v5644_v16, %v3476_v38 }
 0x3c5   : > { %v3617_v13 = vadd.f32 %v3578_v63, %v3544_v20  ;;  %v3545_v56 = vadd.f32 %v5654_v7, %v3522_v23 }
 0x3c6   : > { %v3615_v55 = vadd.f32 %v3573_v30, %v3542_v14  ;;  %v3543_v59 = vadd.f32 %v5654_v7, %v3520_v57 }
 0x3c7   : > { %v3633_v10 = vmax.f32 %v3617_v13, 0.0  ;;  %v3618_v31 = vadd.f32 %v3580_v40, %v3545_v56 }
 0x3c8   : > { %v3631_v17 = vmax.f32 %v3615_v55, 0.0  ;;  %v3616_v48 = vadd.f32 %v3575_v0, %v3543_v59 }
 0x3c9   : > { %3649 = vst [vmem:[%s5672_s25 + $0x50] sm:$0xff] %v3633_v10  ;;  %v3634_v53 = vmax.f32 %v3618_v31, 0.0 }
 0x3ca   : > { %3647 = vst [vmem:[%s5672_s25 + $0x40] sm:$0xff] %v3631_v17  ;;  %v3632_v28 = vmax.f32 %v3616_v48, 0.0 }
 0x3cb   : > { %3650 = vst [vmem:[%s5672_s25 + $0x58] sm:$0xff] %v3634_v53 }
 0x3cc   : > { %3648 = vst [vmem:[%s5672_s25 + $0x48] sm:$0xff] %v3632_v28 }
 0x3d0   : > { %v4001_v21 = vpop.f32.mrb[40].mxu1 }
 0x3d1   : > { %v3525_v4 = vmul.f32 %v4001_v21, %v5644_v16  ;;  %v3489_v50 = vpop.f32.mrb[41].mxu1 }
 0x3d2   : > { %v3523_v3 = vmul.f32 %v5644_v16, %v3489_v50  ;;  %v4002_v32 = vpop.f32.mrb[42].mxu1 }
 0x3d3   : > { %v3548_v49 = vadd.f32 %v5654_v7, %v3525_v4  ;;  %v3526_v18 = vmul.f32 %v4002_v32, %v5644_v16  ;;  %v3492_v9 = vpop.f32.mrb[43].mxu1 }
 0x3d4   : > { %v3546_v2 = vadd.f32 %v5654_v7, %v3523_v3  ;;  %v3524_v35 = vmul.f32 %v5644_v16, %v3492_v9 }
 0x3d5   : > { %v3621_v36 = vadd.f32 %v3588_v47, %v3548_v49  ;;  %v3549_v12 = vadd.f32 %v5654_v7, %v3526_v18 }
 0x3d6   : > { %v3619_v22 = vadd.f32 %v3583_v19, %v3546_v2  ;;  %v3547_v39 = vadd.f32 %v5654_v7, %v3524_v35 }
 0x3d7   : > { %v3637_v24 = vmax.f32 %v3621_v36, 0.0  ;;  %v3622_v42 = vadd.f32 %v3590_v8, %v3549_v12 }
 0x3d8   : > { %v3635_v25 = vmax.f32 %v3619_v22, 0.0  ;;  %v3620_v41 = vadd.f32 %v3585_v43, %v3547_v39 }
 0x3d9   : > { %3653 = vst [vmem:[%s5672_s25 + $0x70] sm:$0xff] %v3637_v24  ;;  %v3638_v16 = vmax.f32 %v3622_v42, 0.0 }
 0x3da   : > { %3651 = vst [vmem:[%s5672_s25 + $0x60] sm:$0xff] %v3635_v25  ;;  %v3636_v7 = vmax.f32 %v3620_v41, 0.0 }
 0x3db   : > { %3654 = vst [vmem:[%s5672_s25 + $0x78] sm:$0xff] %v3638_v16 }
 0x3dc   : > { %3652 = vst [vmem:[%s5672_s25 + $0x68] sm:$0xff] %v3636_v7 }
 0x3dd   : > { %4190 = shalt.err (!%p4187_p6)
}
 0x3de   : > { %s4191_s22 = scalar_lea.hbm %s5747_s21, 2048  ;;  %s4195_s17 = scalar_lea.hbm %s5818_s10, 8192 }
 0x3df   : > { %p4192_p7 = scmp.ne.s32.totalorder %s5747_s21, %s4191_s22  ;;  %p4196_p11 = scmp.lt.u32.totalorder %s5747_s21, %s5818_s10 }
 0x3e0   : > { %p4197_p12 = scmp.lt.u32.totalorder %s4195_s17, %s4191_s22  ;;  %p4199_p0 = scmp.lt.u32.totalorder %s4191_s22, %s5747_s21 }
 0x3e1   : > { %p4193_p9 = pnand %p4192_p7, %p4386_p3 }
 0x3e2   : > { %p4198_p13 = por %p4197_p12, %p4196_p11 }
 0x3e3   : > { %p4194_p10 = pneg %p4193_p9 }
 0x3e4   : > { %p4200_p1 = por %p4199_p0, %p4198_p13 }
 0x3e6   : > { %p4201_p2 = pnand %p4200_p1, %p4194_p10 }
 0x3e8   : > { %4204 = shalt.err (!%p4201_p2)
}
 0x3e9   : > { %s4278_s19 = smov 128   ;;  %s4279_s24 = smov 8  }
 0x3ea   : > { %4020 = dma.vmem_to_hbm [thread:$0]  (%p4386_p3), %s5749_s18, 2048, %s5747_s21, %s5756_s23, %s4278_s19, %s4278_s19, %s4279_s24  }
 0x3eb PF: > { %p4026_p4 = scmp.ge.s32.totalorder %s4271_s20, 2  ;;  %s3687_s28 = sand.u32 1, %s4243_s13  }
 0x3ec   : > { %s3688_s29 = scalar_lea.sflag [#allocation3], %s3687_s28 }
 0x3ed   : > { %p4023_p5 = pnand %p4026_p4, %p4395_p8 }
 0x3ef   : > { %4238 = dma.done.wait (!%p4023_p5), %s3688_s29, 2048  }
 0x3f0   : > { %4240 = vsyncadd (!%p4023_p5), %s3688_s29, 4294965248  ;;  %s23_s20 = sadd.s32 1, %s4271_s20   ;;  %s5875_s16 = sld [smem:[#allocation5_spill]] }
 0x3f1   : > { %p20_p6 = scmp.ge.s32.totalorder %s23_s20, 6   ;;  %s5876_s17 = sld [smem:[#allocation6_spill]] }
 0x3f2   : > { %s5877_s18 = sld [smem:[#allocation7_spill]]  ;;  %s5878_s19 = sld [smem:[#allocation8_spill]] }
 0x3f3   : > { %s5879_s13 = smov %s4247_s14  ;;  %s5880_s14 = smov %s4251_s15 }
 0x3f4   : > { %s5881_s15 = smov %s4404_s11  ;;  %22 = sbr.rel (!%p20_p6) target bundleno = 5 (0x5), region = 96 }
 0x3fb   :  { %3693 = vsyncpa [#allocation3], 1 }
 0x3fc   :  { %3695 = vsyncpa [#allocation3 + $0x1], 1 }

</bundles_post_ra>
